<compile_context>
chip_gen: v6e
topology: v6e:2x2x1
jax: 0.10.0
libtpu: 0.0.40
codegen_flags: <defaults>
</compile_context>

<pallas_src>
import jax
import jax.numpy as jnp
from jax import lax
from jax.experimental import pallas as pl
from jax.experimental.pallas import tpu as pltpu


HID = 8        # hidden channels of the simplified G / M nets
TDIM = 8       # time-embedding width
CH = 8         # channel padding (f32 sublane granularity) used inside the kernel
LANE = 128     # TPU lane width


# ----------------------------------------------------------------------------
# Fused kernel: G (3 convs + temb) -> M (3 convs) -> bilinear warp, per grid step.
# ----------------------------------------------------------------------------
def _fused_kernel(xg_ref, mT_ref, temb_ref, mesh_ref, w_ref, b_ref, out_ref):
    # shapes (all static):
    #   xg_ref   : (1, CH, N)       f32  batch-folded padded-flat G input
    #                                    rows = [f, ft, m, 0...], zero ring
    #   mT_ref   : (B_blk, Wp, Hp)  f32  m transposed, ring padded with -1
    #   temb_ref : (1, CH, B_blk)   f32  time embedding per batch element
    #   mesh_ref : (3, N)           f32  rows = [i coord, j coord, interior mask]
    #   w_ref    : (6, CH, 9*CH)    bf16 packed conv weights (tap-major columns)
    #   b_ref    : (6, CH, 1)       f32  packed conv biases
    #   out_ref  : (1, 8, N)        f32  rows = [eps, dH, dW, mphi, 0,0,0,0]
    B_blk, Wp, Hp = mT_ref.shape
    N = xg_ref.shape[2]
    LP = N // B_blk                      # lane-padded per-batch flat size

    mesh = mesh_ref[...]
    mask = mesh[2:3]                     # (1, N)  1 on interior, 0 on ring/pad
    i_mesh = mesh[0:1, 0:LP]             # (1, LP) padded row coordinate
    j_mesh = mesh[1:2, 0:LP]             # (1, LP) padded col coordinate
    mask_lp = mesh[2:3, 0:LP]

    def conv(h, layer, relu):
        # h: (CH, N) f32, exactly zero on the ring + lane padding.
        taps = []
        for dy in range(3):
            for dx in range(3):
                s = (dy - 1) * Wp + (dx - 1)          # flat shift of this tap
                if s == 0:
                    taps.append(h)
                else:
                    # Circular wrap only contaminates ring / lane-pad positions,
                    # which are re-masked below; interior taps never wrap.
                    taps.append(pltpu.roll(h, shift=(-s) % N, axis=1))
        x_col = jnp.concatenate(taps, axis=0).astype(jnp.bfloat16)   # (9*CH, N)
        acc = jnp.dot(w_ref[layer], x_col,
                      preferred_element_type=jnp.float32)            # (CH, N)
        acc = acc + b_ref[layer]
        if relu:
            acc = jnp.maximum(acc, 0.0)
        return acc * mask                # re-zero the pad ring for the next layer

    xg0 = xg_ref[0]                                    # (CH, N)

    # --------------------------- G network -----------------------------------
    h = conv(xg0, 0, True)                             # conv1 + relu
    temb = temb_ref[0]                                 # (CH, B_blk)
    segs = [h[:, bb * LP:(bb + 1) * LP] + temb[:, bb:bb + 1]
            for bb in range(B_blk)]
    h = (jnp.concatenate(segs, axis=1) if B_blk > 1 else segs[0]) * mask
    h = conv(h, 1, True)                               # conv2 + relu
    eps_full = conv(h, 2, False)                       # row 0 = eps, rows 1..7 = 0

    # --------------------------- M network -----------------------------------
    # M input channels: row 0 = eps, row 2 = m (m sits at row 2 of xg).
    sel_m = (lax.broadcasted_iota(jnp.int32, (CH, 1), 0) == 2).astype(jnp.float32)
    h = conv(eps_full + xg0 * sel_m, 3, True)
    h = conv(h, 4, True)
    phi_full = conv(h, 5, False)                       # rows 0,1 = (dH, dW)

    # merged lane-dense output slab
    out_ref[0, 0:1, :] = eps_full[0:1]
    out_ref[0, 1:3, :] = phi_full[0:2]
    out_ref[0, 4:8, :] = jnp.zeros((4, N), jnp.float32)

    # --------------------------- bilinear warp -------------------------------
    h_iota = lax.broadcasted_iota(jnp.int32, (Hp, LP), 0)
    w_iota = lax.broadcasted_iota(jnp.int32, (Wp, LP), 0)
    for bb in range(B_blk):
        lo = bb * LP
        # (m + 1)/2 folded into the image load; ring padded with -1 -> exactly 0.
        m01T = ((mT_ref[bb] + 1.0) * 0.5).astype(jnp.bfloat16)       # (Wp, Hp)
        dH = phi_full[0:1, lo:lo + LP]
        dW = phi_full[1:2, lo:lo + LP]
        Hu = dH + i_mesh                                             # sample row
        Wu = dW + j_mesh                                             # sample col
        hf_f = jnp.floor(Hu)
        wf_f = jnp.floor(Wu)
        fh = Hu - hf_f
        fw = Wu - wf_f
        hf = jnp.clip(hf_f.astype(jnp.int32), 0, Hp - 1)
        hc = jnp.clip(hf_f.astype(jnp.int32) + 1, 0, Hp - 1)
        wf = jnp.clip(wf_f.astype(jnp.int32), 0, Wp - 1)
        wc = jnp.clip(wf_f.astype(jnp.int32) + 1, 0, Wp - 1)
        # Separable bilinear weights (source axis on sublanes -> no transposes).
        a_row = ((h_iota == hf).astype(jnp.float32) * (1.0 - fh)
                 + (h_iota == hc).astype(jnp.float32) * fh)          # (Hp, LP)
        b_col = ((w_iota == wf).astype(jnp.float32) * (1.0 - fw)
                 + (w_iota == wc).astype(jnp.float32) * fw)          # (Wp, LP)
        rowmix = jnp.dot(m01T, a_row.astype(jnp.bfloat16),
                         preferred_element_type=jnp.float32)         # (Wp, LP) MXU
        vals = jnp.sum(rowmix * b_col, axis=0, keepdims=True)        # (1, LP)
        out_ref[0, 3:4, lo:lo + LP] = vals * mask_lp


# ----------------------------------------------------------------------------
# One-time weight packing (done in init_params, NOT in the per-call path).
# ----------------------------------------------------------------------------
def _pack_w(w, cin_pos):
    """(Cout, Cin, 3, 3) -> (CH, 9*CH) bf16, columns tap-major, input channel k
    placed at padded-channel position cin_pos[k]."""
    cout = w.shape[0]
    wt = jnp.transpose(w, (0, 2, 3, 1)).astype(jnp.float32)          # (Cout,3,3,Cin)
    full = jnp.zeros((CH, 3, 3, CH), jnp.float32)
    for k, pos in enumerate(cin_pos):
        full = full.at[:cout, :, :, pos].set(wt[:, :, :, k])
    return full.reshape(CH, 9 * CH).astype(jnp.bfloat16)


def _pack_b(b):
    return jnp.zeros((CH,), jnp.float32).at[:b.shape[0]].set(b).reshape(CH, 1)


def init_params(key):
    ks = jax.random.split(key, 8)

    def conv_w(k, cout, cin):
        return (jax.random.normal(k, (cout, cin, 3, 3), jnp.float32)
                * (1.0 / jnp.sqrt(cin * 9.0)))

    g_w1 = conv_w(ks[0], HID, 3);  g_b1 = jnp.zeros((HID,), jnp.float32)
    g_w2 = conv_w(ks[1], HID, HID); g_b2 = jnp.zeros((HID,), jnp.float32)
    g_w3 = conv_w(ks[2], 1, HID);   g_b3 = jnp.zeros((1,), jnp.float32)
    m_w1 = conv_w(ks[4], HID, 2);   m_b1 = jnp.zeros((HID,), jnp.float32)
    m_w2 = conv_w(ks[5], HID, HID); m_b2 = jnp.zeros((HID,), jnp.float32)
    m_w3 = conv_w(ks[6], 2, HID);   m_b3 = jnp.zeros((2,), jnp.float32)

    # Pack once here so the forward pass carries zero packing glue.
    w_all = jnp.stack([
        _pack_w(g_w1, [2, 0, 1]),            # G conv1: original order (m, f, ft)
        _pack_w(g_w2, list(range(HID))),
        _pack_w(g_w3, list(range(HID))),
        _pack_w(m_w1, [0, 2]),               # M conv1: original order (eps, m)
        _pack_w(m_w2, list(range(HID))),
        _pack_w(m_w3, list(range(HID))),
    ])                                        # (6, CH, 9*CH) bf16
    b_all = jnp.stack([_pack_b(g_b1), _pack_b(g_b2), _pack_b(g_b3),
                       _pack_b(m_b1), _pack_b(m_b2), _pack_b(m_b3)])  # (6, CH, 1)

    return {
        "w_all": w_all, "b_all": b_all,
        "g_tw": jax.random.normal(ks[3], (TDIM, HID), jnp.float32)
                / jnp.sqrt(float(TDIM)),
        "g_tb": jnp.zeros((HID,), jnp.float32),
    }


def time_embedding(t, dim=TDIM):
    half = dim // 2
    freqs = jnp.exp(-jnp.log(10000.0) * jnp.arange(half, dtype=jnp.float32) / half)
    args = t[:, None].astype(jnp.float32) * freqs[None, :]
    return jnp.concatenate([jnp.sin(args), jnp.cos(args)], axis=1)    # (B, dim)


# ----------------------------------------------------------------------------
# Forward pass.
# ----------------------------------------------------------------------------
def model_forward(params, m, f, ft, t):
    B, _, H, W = m.shape
    Hp, Wp = H + 2, W + 2
    HpWp = Hp * Wp
    LP = ((HpWp + LANE - 1) // LANE) * LANE        # lane-dense flat size (324->384)
    GB = 2 if (B % 2 == 0 and B >= 2) else 1       # >=2 grid steps keeps both v7x
    B_blk = B // GB                                # TCs busy; batch elements per
    N = B_blk * LP                                 # step fold into the matmul N.

    # ---- input packing (tiny plain-JAX glue) --------------------------------
    x = jnp.concatenate([f, ft, m, jnp.zeros((B, CH - 3, H, W), m.dtype)], axis=1)
    xg = jnp.pad(x, ((0, 0), (0, 0), (1, 1), (1, 1))).reshape(B, CH, HpWp)
    xg = jnp.pad(xg.astype(jnp.float32), ((0, 0), (0, 0), (0, LP - HpWp)))
    xg = xg.reshape(GB, B_blk, CH, LP).transpose(0, 2, 1, 3).reshape(GB, CH, N)

    # m transposed (separable warp) and padded with -1 so (v+1)/2 is 0 on the ring.
    mT = jnp.pad(jnp.swapaxes(m[:, 0], 1, 2), ((0, 0), (1, 1), (1, 1)),
                 constant_values=-1.0).astype(jnp.float32)            # (B, Wp, Hp)

    temb = (time_embedding(t) @ params["g_tw"] + params["g_tb"]).astype(jnp.float32)
    temb = temb.reshape(GB, B_blk, CH).transpose(0, 2, 1)             # (GB, CH, B_blk)

    ii = jnp.repeat(jnp.arange(Hp, dtype=jnp.float32), Wp)
    jj = jnp.tile(jnp.arange(Wp, dtype=jnp.float32), Hp)
    interior = ((ii >= 1) & (ii <= H) & (jj >= 1) & (jj <= W)).astype(jnp.float32)
    mesh = jnp.stack([ii, jj, interior], axis=0)                      # (3, HpWp)
    mesh = jnp.pad(mesh, ((0, 0), (0, LP - HpWp)))
    mesh = jnp.tile(mesh, (1, B_blk))                                 # (3, N)

    out = pl.pallas_call(
        _fused_kernel,
        out_shape=jax.ShapeDtypeStruct((GB, 8, N), jnp.float32),
        grid=(GB,),
        in_specs=[
            pl.BlockSpec((1, CH, N), lambda g: (g, 0, 0)),
            pl.BlockSpec((B_blk, Wp, Hp), lambda g: (g, 0, 0)),
            pl.BlockSpec((1, CH, B_blk), lambda g: (g, 0, 0)),
            pl.BlockSpec((3, N), lambda g: (0, 0)),
            pl.BlockSpec((6, CH, 9 * CH), lambda g: (0, 0, 0)),
            pl.BlockSpec((6, CH, 1), lambda g: (0, 0, 0)),
        ],
        out_specs=pl.BlockSpec((1, 8, N), lambda g: (g, 0, 0)),
        compiler_params=pltpu.CompilerParams(dimension_semantics=("parallel",)),
    )(xg, mT, temb, mesh, params["w_all"], params["b_all"])

    # ---- output unpacking (tiny plain-JAX glue) ------------------------------
    out = out.reshape(GB, 8, B_blk, LP).transpose(0, 2, 1, 3).reshape(B, 8, LP)
    out = out[:, :, :HpWp].reshape(B, 8, Hp, Wp)[:, :, 1:H + 1, 1:W + 1]
    epsilonhat = out[:, 0:1]
    phi = out[:, 1:3]
    mphi = out[:, 3:4]
    return epsilonhat, mphi, phi


# ----------------------------------------------------------------------------
if __name__ == "__main__":
    B, H, W = 2, 16, 16
    key = jax.random.PRNGKey(0)
    km, kf, kft, kt = jax.random.split(key, 4)
    m = jax.random.uniform(km, (B, 1, H, W), jnp.float32, minval=-1.0, maxval=1.0)
    f = jax.random.uniform(kf, (B, 1, H, W), jnp.float32, minval=-1.0, maxval=1.0)
    ft = jax.random.uniform(kft, (B, 1, H, W), jnp.float32, minval=-1.0, maxval=1.0)
    t = jax.random.uniform(kt, (B,), jnp.float32, minval=0.0, maxval=1.0)

    params = init_params(jax.random.PRNGKey(42))

    fwd = jax.jit(model_forward)
    epsilonhat, mphi, phi = fwd(params, m, f, ft, t)
    jax.block_until_ready((epsilonhat, mphi, phi))

    assert epsilonhat.shape == (B, 1, H, W)
    assert mphi.shape == (B, 1, H, W)
    assert phi.shape == (B, 2, H, W)
    assert bool(jnp.all(jnp.isfinite(epsilonhat)))
    assert bool(jnp.all(jnp.isfinite(mphi)))
    assert bool(jnp.all(jnp.isfinite(phi)))
    print("KERNEL_OK")
</pallas_src>

<mosaic_0001>
module attributes {stable_mosaic.version = 11 : i64} {
  func.func @_fused_kernel(%arg0: i32, %arg1: memref<1x8x384xf32, #tpu.memory_space<vmem>>, %arg2: memref<1x18x18xf32, #tpu.memory_space<vmem>>, %arg3: memref<1x8x1xf32, #tpu.memory_space<vmem>>, %arg4: memref<3x384xf32, #tpu.memory_space<vmem>>, %arg5: memref<6x8x72xbf16, #tpu.memory_space<vmem>>, %arg6: memref<6x8x1xf32, #tpu.memory_space<vmem>>, %arg7: memref<1x8x384xf32, #tpu.memory_space<vmem>>) attributes {dimension_semantics = [#tpu.dimension_semantics<parallel>], iteration_bounds = array<i64: 2>, scalar_prefetch = 0 : i64, scratch_operands = 0 : i64, tpu.core_type = #tpu.core_type<tc>, window_params = [{transform_indices = @transform_0, window_bounds = array<i64: 1, 8, 384>}, {transform_indices = @transform_1, window_bounds = array<i64: 1, 18, 18>}, {transform_indices = @transform_2, window_bounds = array<i64: 1, 8, 1>}, {pipeline_mode = #tpu.pipeline_mode<synchronous>, transform_indices = @transform_3, window_bounds = array<i64: 3, 384>}, {pipeline_mode = #tpu.pipeline_mode<synchronous>, transform_indices = @transform_4, window_bounds = array<i64: 6, 8, 72>}, {pipeline_mode = #tpu.pipeline_mode<synchronous>, transform_indices = @transform_5, window_bounds = array<i64: 6, 8, 1>}, {transform_indices = @transform_6, window_bounds = array<i64: 1, 8, 384>}]} {
    %c0 = arith.constant 0 : index
    %c0_0 = arith.constant 0 : index
    %0 = vector.load %arg4[%c0, %c0_0] : memref<3x384xf32, #tpu.memory_space<vmem>>, vector<3x384xf32>
    %1 = vector.extract_strided_slice %0 {offsets = [2, 0], sizes = [1, 384], strides = [1, 1]} : vector<3x384xf32> to vector<1x384xf32>
    %2 = vector.extract_strided_slice %0 {offsets = [0, 0], sizes = [1, 384], strides = [1, 1]} : vector<3x384xf32> to vector<1x384xf32>
    %3 = vector.extract_strided_slice %0 {offsets = [1, 0], sizes = [1, 384], strides = [1, 1]} : vector<3x384xf32> to vector<1x384xf32>
    %4 = vector.extract_strided_slice %0 {offsets = [2, 0], sizes = [1, 384], strides = [1, 1]} : vector<3x384xf32> to vector<1x384xf32>
    %c0_1 = arith.constant 0 : index
    %c0_2 = arith.constant 0 : index
    %c0_3 = arith.constant 0 : index
    %5 = vector.load %arg1[%c0_1, %c0_2, %c0_3] : memref<1x8x384xf32, #tpu.memory_space<vmem>>, vector<1x8x384xf32>
    %6 = vector.shape_cast %5 : vector<1x8x384xf32> to vector<8x384xf32>
    %c19_i32 = arith.constant 19 : i32
    %7 = tpu.dynamic_rotate %6 by %c19_i32 dim 1 : vector<8x384xf32>, i32 -> vector<8x384xf32>
    %c18_i32 = arith.constant 18 : i32
    %8 = tpu.dynamic_rotate %6 by %c18_i32 dim 1 : vector<8x384xf32>, i32 -> vector<8x384xf32>
    %c17_i32 = arith.constant 17 : i32
    %9 = tpu.dynamic_rotate %6 by %c17_i32 dim 1 : vector<8x384xf32>, i32 -> vector<8x384xf32>
    %c1_i32 = arith.constant 1 : i32
    %10 = tpu.dynamic_rotate %6 by %c1_i32 dim 1 : vector<8x384xf32>, i32 -> vector<8x384xf32>
    %c383_i32 = arith.constant 383 : i32
    %11 = tpu.dynamic_rotate %6 by %c383_i32 dim 1 : vector<8x384xf32>, i32 -> vector<8x384xf32>
    %c367_i32 = arith.constant 367 : i32
    %12 = tpu.dynamic_rotate %6 by %c367_i32 dim 1 : vector<8x384xf32>, i32 -> vector<8x384xf32>
    %c366_i32 = arith.constant 366 : i32
    %13 = tpu.dynamic_rotate %6 by %c366_i32 dim 1 : vector<8x384xf32>, i32 -> vector<8x384xf32>
    %c365_i32 = arith.constant 365 : i32
    %14 = tpu.dynamic_rotate %6 by %c365_i32 dim 1 : vector<8x384xf32>, i32 -> vector<8x384xf32>
    %15 = tpu.concatenate %7, %8, %9, %10, %6, %11, %12, %13, %14 in 0 : vector<8x384xf32>, vector<8x384xf32>, vector<8x384xf32>, vector<8x384xf32>, vector<8x384xf32>, vector<8x384xf32>, vector<8x384xf32>, vector<8x384xf32>, vector<8x384xf32> -> vector<72x384xf32>
    %16 = arith.truncf %15 : vector<72x384xf32> to vector<72x384xbf16>
    %c0_4 = arith.constant 0 : index
    %c0_5 = arith.constant 0 : index
    %c0_6 = arith.constant 0 : index
    %17 = vector.load %arg5[%c0_4, %c0_5, %c0_6] : memref<6x8x72xbf16, #tpu.memory_space<vmem>>, vector<1x8x72xbf16>
    %18 = vector.shape_cast %17 : vector<1x8x72xbf16> to vector<8x72xbf16>
    %cst = arith.constant dense<0.000000e+00> : vector<8x384xf32>
    %19 = tpu.matmul %18, %16, %cst {dimension_numbers = #tpu.dot_dimension_numbers<[1], [0], [0], [1], [0, 0, 1, 1], [], []>} : vector<8x72xbf16>, vector<72x384xbf16>, vector<8x384xf32> -> vector<8x384xf32>
    %c0_7 = arith.constant 0 : index
    %c0_8 = arith.constant 0 : index
    %c0_9 = arith.constant 0 : index
    %20 = vector.load %arg6[%c0_7, %c0_8, %c0_9] : memref<6x8x1xf32, #tpu.memory_space<vmem>>, vector<1x8x1xf32>
    %21 = vector.shape_cast %20 : vector<1x8x1xf32> to vector<8x1xf32>
    %22 = vector.broadcast %21 : vector<8x1xf32> to vector<8x384xf32>
    %23 = arith.addf %19, %22 : vector<8x384xf32>
    %cst_10 = arith.constant 0.000000e+00 : f32
    %24 = vector.broadcast %cst_10 : f32 to vector<8x384xf32>
    %25 = arith.maximumf %23, %24 : vector<8x384xf32>
    %26 = vector.broadcast %1 : vector<1x384xf32> to vector<8x384xf32>
    %27 = arith.mulf %25, %26 : vector<8x384xf32>
    %c0_11 = arith.constant 0 : index
    %c0_12 = arith.constant 0 : index
    %c0_13 = arith.constant 0 : index
    %28 = vector.load %arg3[%c0_11, %c0_12, %c0_13] : memref<1x8x1xf32, #tpu.memory_space<vmem>>, vector<1x8x1xf32>
    %29 = vector.shape_cast %28 : vector<1x8x1xf32> to vector<8x1xf32>
    %30 = vector.broadcast %29 : vector<8x1xf32> to vector<8x384xf32>
    %31 = arith.addf %27, %30 : vector<8x384xf32>
    %32 = vector.broadcast %1 : vector<1x384xf32> to vector<8x384xf32>
    %33 = arith.mulf %31, %32 : vector<8x384xf32>
    %c19_i32_14 = arith.constant 19 : i32
    %34 = tpu.dynamic_rotate %33 by %c19_i32_14 dim 1 : vector<8x384xf32>, i32 -> vector<8x384xf32>
    %c18_i32_15 = arith.constant 18 : i32
    %35 = tpu.dynamic_rotate %33 by %c18_i32_15 dim 1 : vector<8x384xf32>, i32 -> vector<8x384xf32>
    %c17_i32_16 = arith.constant 17 : i32
    %36 = tpu.dynamic_rotate %33 by %c17_i32_16 dim 1 : vector<8x384xf32>, i32 -> vector<8x384xf32>
    %c1_i32_17 = arith.constant 1 : i32
    %37 = tpu.dynamic_rotate %33 by %c1_i32_17 dim 1 : vector<8x384xf32>, i32 -> vector<8x384xf32>
    %c383_i32_18 = arith.constant 383 : i32
    %38 = tpu.dynamic_rotate %33 by %c383_i32_18 dim 1 : vector<8x384xf32>, i32 -> vector<8x384xf32>
    %c367_i32_19 = arith.constant 367 : i32
    %39 = tpu.dynamic_rotate %33 by %c367_i32_19 dim 1 : vector<8x384xf32>, i32 -> vector<8x384xf32>
    %c366_i32_20 = arith.constant 366 : i32
    %40 = tpu.dynamic_rotate %33 by %c366_i32_20 dim 1 : vector<8x384xf32>, i32 -> vector<8x384xf32>
    %c365_i32_21 = arith.constant 365 : i32
    %41 = tpu.dynamic_rotate %33 by %c365_i32_21 dim 1 : vector<8x384xf32>, i32 -> vector<8x384xf32>
    %42 = tpu.concatenate %34, %35, %36, %37, %33, %38, %39, %40, %41 in 0 : vector<8x384xf32>, vector<8x384xf32>, vector<8x384xf32>, vector<8x384xf32>, vector<8x384xf32>, vector<8x384xf32>, vector<8x384xf32>, vector<8x384xf32>, vector<8x384xf32> -> vector<72x384xf32>
    %43 = arith.truncf %42 : vector<72x384xf32> to vector<72x384xbf16>
    %c1 = arith.constant 1 : index
    %c0_22 = arith.constant 0 : index
    %c0_23 = arith.constant 0 : index
    %44 = vector.load %arg5[%c1, %c0_22, %c0_23] : memref<6x8x72xbf16, #tpu.memory_space<vmem>>, vector<1x8x72xbf16>
    %45 = vector.shape_cast %44 : vector<1x8x72xbf16> to vector<8x72xbf16>
    %cst_24 = arith.constant dense<0.000000e+00> : vector<8x384xf32>
    %46 = tpu.matmul %45, %43, %cst_24 {dimension_numbers = #tpu.dot_dimension_numbers<[1], [0], [0], [1], [0, 0, 1, 1], [], []>} : vector<8x72xbf16>, vector<72x384xbf16>, vector<8x384xf32> -> vector<8x384xf32>
    %c1_25 = arith.constant 1 : index
    %c0_26 = arith.constant 0 : index
    %c0_27 = arith.constant 0 : index
    %47 = vector.load %arg6[%c1_25, %c0_26, %c0_27] : memref<6x8x1xf32, #tpu.memory_space<vmem>>, vector<1x8x1xf32>
    %48 = vector.shape_cast %47 : vector<1x8x1xf32> to vector<8x1xf32>
    %49 = vector.broadcast %48 : vector<8x1xf32> to vector<8x384xf32>
    %50 = arith.addf %46, %49 : vector<8x384xf32>
    %cst_28 = arith.constant 0.000000e+00 : f32
    %51 = vector.broadcast %cst_28 : f32 to vector<8x384xf32>
    %52 = arith.maximumf %50, %51 : vector<8x384xf32>
    %53 = vector.broadcast %1 : vector<1x384xf32> to vector<8x384xf32>
    %54 = arith.mulf %52, %53 : vector<8x384xf32>
    %c19_i32_29 = arith.constant 19 : i32
    %55 = tpu.dynamic_rotate %54 by %c19_i32_29 dim 1 : vector<8x384xf32>, i32 -> vector<8x384xf32>
    %c18_i32_30 = arith.constant 18 : i32
    %56 = tpu.dynamic_rotate %54 by %c18_i32_30 dim 1 : vector<8x384xf32>, i32 -> vector<8x384xf32>
    %c17_i32_31 = arith.constant 17 : i32
    %57 = tpu.dynamic_rotate %54 by %c17_i32_31 dim 1 : vector<8x384xf32>, i32 -> vector<8x384xf32>
    %c1_i32_32 = arith.constant 1 : i32
    %58 = tpu.dynamic_rotate %54 by %c1_i32_32 dim 1 : vector<8x384xf32>, i32 -> vector<8x384xf32>
    %c383_i32_33 = arith.constant 383 : i32
    %59 = tpu.dynamic_rotate %54 by %c383_i32_33 dim 1 : vector<8x384xf32>, i32 -> vector<8x384xf32>
    %c367_i32_34 = arith.constant 367 : i32
    %60 = tpu.dynamic_rotate %54 by %c367_i32_34 dim 1 : vector<8x384xf32>, i32 -> vector<8x384xf32>
    %c366_i32_35 = arith.constant 366 : i32
    %61 = tpu.dynamic_rotate %54 by %c366_i32_35 dim 1 : vector<8x384xf32>, i32 -> vector<8x384xf32>
    %c365_i32_36 = arith.constant 365 : i32
    %62 = tpu.dynamic_rotate %54 by %c365_i32_36 dim 1 : vector<8x384xf32>, i32 -> vector<8x384xf32>
    %63 = tpu.concatenate %55, %56, %57, %58, %54, %59, %60, %61, %62 in 0 : vector<8x384xf32>, vector<8x384xf32>, vector<8x384xf32>, vector<8x384xf32>, vector<8x384xf32>, vector<8x384xf32>, vector<8x384xf32>, vector<8x384xf32>, vector<8x384xf32> -> vector<72x384xf32>
    %64 = arith.truncf %63 : vector<72x384xf32> to vector<72x384xbf16>
    %c2 = arith.constant 2 : index
    %c0_37 = arith.constant 0 : index
    %c0_38 = arith.constant 0 : index
    %65 = vector.load %arg5[%c2, %c0_37, %c0_38] : memref<6x8x72xbf16, #tpu.memory_space<vmem>>, vector<1x8x72xbf16>
    %66 = vector.shape_cast %65 : vector<1x8x72xbf16> to vector<8x72xbf16>
    %cst_39 = arith.constant dense<0.000000e+00> : vector<8x384xf32>
    %67 = tpu.matmul %66, %64, %cst_39 {dimension_numbers = #tpu.dot_dimension_numbers<[1], [0], [0], [1], [0, 0, 1, 1], [], []>} : vector<8x72xbf16>, vector<72x384xbf16>, vector<8x384xf32> -> vector<8x384xf32>
    %c2_40 = arith.constant 2 : index
    %c0_41 = arith.constant 0 : index
    %c0_42 = arith.constant 0 : index
    %68 = vector.load %arg6[%c2_40, %c0_41, %c0_42] : memref<6x8x1xf32, #tpu.memory_space<vmem>>, vector<1x8x1xf32>
    %69 = vector.shape_cast %68 : vector<1x8x1xf32> to vector<8x1xf32>
    %70 = vector.broadcast %69 : vector<8x1xf32> to vector<8x384xf32>
    %71 = arith.addf %67, %70 : vector<8x384xf32>
    %72 = vector.broadcast %1 : vector<1x384xf32> to vector<8x384xf32>
    %73 = arith.mulf %71, %72 : vector<8x384xf32>
    %74 = tpu.iota {dimensions = array<i32: 0>} : vector<8x1xi32>
    %c2_i32 = arith.constant 2 : i32
    %75 = vector.broadcast %c2_i32 : i32 to vector<8x1xi32>
    %76 = arith.cmpi eq, %74, %75 : vector<8x1xi32>
    %77 = arith.extui %76 : vector<8x1xi1> to vector<8x1xi32>
    %78 = arith.sitofp %77 : vector<8x1xi32> to vector<8x1xf32>
    %79 = vector.broadcast %78 : vector<8x1xf32> to vector<8x384xf32>
    %80 = arith.mulf %6, %79 : vector<8x384xf32>
    %81 = arith.addf %73, %80 : vector<8x384xf32>
    %c19_i32_43 = arith.constant 19 : i32
    %82 = tpu.dynamic_rotate %81 by %c19_i32_43 dim 1 : vector<8x384xf32>, i32 -> vector<8x384xf32>
    %c18_i32_44 = arith.constant 18 : i32
    %83 = tpu.dynamic_rotate %81 by %c18_i32_44 dim 1 : vector<8x384xf32>, i32 -> vector<8x384xf32>
    %c17_i32_45 = arith.constant 17 : i32
    %84 = tpu.dynamic_rotate %81 by %c17_i32_45 dim 1 : vector<8x384xf32>, i32 -> vector<8x384xf32>
    %c1_i32_46 = arith.constant 1 : i32
    %85 = tpu.dynamic_rotate %81 by %c1_i32_46 dim 1 : vector<8x384xf32>, i32 -> vector<8x384xf32>
    %c383_i32_47 = arith.constant 383 : i32
    %86 = tpu.dynamic_rotate %81 by %c383_i32_47 dim 1 : vector<8x384xf32>, i32 -> vector<8x384xf32>
    %c367_i32_48 = arith.constant 367 : i32
    %87 = tpu.dynamic_rotate %81 by %c367_i32_48 dim 1 : vector<8x384xf32>, i32 -> vector<8x384xf32>
    %c366_i32_49 = arith.constant 366 : i32
    %88 = tpu.dynamic_rotate %81 by %c366_i32_49 dim 1 : vector<8x384xf32>, i32 -> vector<8x384xf32>
    %c365_i32_50 = arith.constant 365 : i32
    %89 = tpu.dynamic_rotate %81 by %c365_i32_50 dim 1 : vector<8x384xf32>, i32 -> vector<8x384xf32>
    %90 = tpu.concatenate %82, %83, %84, %85, %81, %86, %87, %88, %89 in 0 : vector<8x384xf32>, vector<8x384xf32>, vector<8x384xf32>, vector<8x384xf32>, vector<8x384xf32>, vector<8x384xf32>, vector<8x384xf32>, vector<8x384xf32>, vector<8x384xf32> -> vector<72x384xf32>
    %91 = arith.truncf %90 : vector<72x384xf32> to vector<72x384xbf16>
    %c3 = arith.constant 3 : index
    %c0_51 = arith.constant 0 : index
    %c0_52 = arith.constant 0 : index
    %92 = vector.load %arg5[%c3, %c0_51, %c0_52] : memref<6x8x72xbf16, #tpu.memory_space<vmem>>, vector<1x8x72xbf16>
    %93 = vector.shape_cast %92 : vector<1x8x72xbf16> to vector<8x72xbf16>
    %cst_53 = arith.constant dense<0.000000e+00> : vector<8x384xf32>
    %94 = tpu.matmul %93, %91, %cst_53 {dimension_numbers = #tpu.dot_dimension_numbers<[1], [0], [0], [1], [0, 0, 1, 1], [], []>} : vector<8x72xbf16>, vector<72x384xbf16>, vector<8x384xf32> -> vector<8x384xf32>
    %c3_54 = arith.constant 3 : index
    %c0_55 = arith.constant 0 : index
    %c0_56 = arith.constant 0 : index
    %95 = vector.load %arg6[%c3_54, %c0_55, %c0_56] : memref<6x8x1xf32, #tpu.memory_space<vmem>>, vector<1x8x1xf32>
    %96 = vector.shape_cast %95 : vector<1x8x1xf32> to vector<8x1xf32>
    %97 = vector.broadcast %96 : vector<8x1xf32> to vector<8x384xf32>
    %98 = arith.addf %94, %97 : vector<8x384xf32>
    %cst_57 = arith.constant 0.000000e+00 : f32
    %99 = vector.broadcast %cst_57 : f32 to vector<8x384xf32>
    %100 = arith.maximumf %98, %99 : vector<8x384xf32>
    %101 = vector.broadcast %1 : vector<1x384xf32> to vector<8x384xf32>
    %102 = arith.mulf %100, %101 : vector<8x384xf32>
    %c19_i32_58 = arith.constant 19 : i32
    %103 = tpu.dynamic_rotate %102 by %c19_i32_58 dim 1 : vector<8x384xf32>, i32 -> vector<8x384xf32>
    %c18_i32_59 = arith.constant 18 : i32
    %104 = tpu.dynamic_rotate %102 by %c18_i32_59 dim 1 : vector<8x384xf32>, i32 -> vector<8x384xf32>
    %c17_i32_60 = arith.constant 17 : i32
    %105 = tpu.dynamic_rotate %102 by %c17_i32_60 dim 1 : vector<8x384xf32>, i32 -> vector<8x384xf32>
    %c1_i32_61 = arith.constant 1 : i32
    %106 = tpu.dynamic_rotate %102 by %c1_i32_61 dim 1 : vector<8x384xf32>, i32 -> vector<8x384xf32>
    %c383_i32_62 = arith.constant 383 : i32
    %107 = tpu.dynamic_rotate %102 by %c383_i32_62 dim 1 : vector<8x384xf32>, i32 -> vector<8x384xf32>
    %c367_i32_63 = arith.constant 367 : i32
    %108 = tpu.dynamic_rotate %102 by %c367_i32_63 dim 1 : vector<8x384xf32>, i32 -> vector<8x384xf32>
    %c366_i32_64 = arith.constant 366 : i32
    %109 = tpu.dynamic_rotate %102 by %c366_i32_64 dim 1 : vector<8x384xf32>, i32 -> vector<8x384xf32>
    %c365_i32_65 = arith.constant 365 : i32
    %110 = tpu.dynamic_rotate %102 by %c365_i32_65 dim 1 : vector<8x384xf32>, i32 -> vector<8x384xf32>
    %111 = tpu.concatenate %103, %104, %105, %106, %102, %107, %108, %109, %110 in 0 : vector<8x384xf32>, vector<8x384xf32>, vector<8x384xf32>, vector<8x384xf32>, vector<8x384xf32>, vector<8x384xf32>, vector<8x384xf32>, vector<8x384xf32>, vector<8x384xf32> -> vector<72x384xf32>
    %112 = arith.truncf %111 : vector<72x384xf32> to vector<72x384xbf16>
    %c4 = arith.constant 4 : index
    %c0_66 = arith.constant 0 : index
    %c0_67 = arith.constant 0 : index
    %113 = vector.load %arg5[%c4, %c0_66, %c0_67] : memref<6x8x72xbf16, #tpu.memory_space<vmem>>, vector<1x8x72xbf16>
    %114 = vector.shape_cast %113 : vector<1x8x72xbf16> to vector<8x72xbf16>
    %cst_68 = arith.constant dense<0.000000e+00> : vector<8x384xf32>
    %115 = tpu.matmul %114, %112, %cst_68 {dimension_numbers = #tpu.dot_dimension_numbers<[1], [0], [0], [1], [0, 0, 1, 1], [], []>} : vector<8x72xbf16>, vector<72x384xbf16>, vector<8x384xf32> -> vector<8x384xf32>
    %c4_69 = arith.constant 4 : index
    %c0_70 = arith.constant 0 : index
    %c0_71 = arith.constant 0 : index
    %116 = vector.load %arg6[%c4_69, %c0_70, %c0_71] : memref<6x8x1xf32, #tpu.memory_space<vmem>>, vector<1x8x1xf32>
    %117 = vector.shape_cast %116 : vector<1x8x1xf32> to vector<8x1xf32>
    %118 = vector.broadcast %117 : vector<8x1xf32> to vector<8x384xf32>
    %119 = arith.addf %115, %118 : vector<8x384xf32>
    %cst_72 = arith.constant 0.000000e+00 : f32
    %120 = vector.broadcast %cst_72 : f32 to vector<8x384xf32>
    %121 = arith.maximumf %119, %120 : vector<8x384xf32>
    %122 = vector.broadcast %1 : vector<1x384xf32> to vector<8x384xf32>
    %123 = arith.mulf %121, %122 : vector<8x384xf32>
    %c19_i32_73 = arith.constant 19 : i32
    %124 = tpu.dynamic_rotate %123 by %c19_i32_73 dim 1 : vector<8x384xf32>, i32 -> vector<8x384xf32>
    %c18_i32_74 = arith.constant 18 : i32
    %125 = tpu.dynamic_rotate %123 by %c18_i32_74 dim 1 : vector<8x384xf32>, i32 -> vector<8x384xf32>
    %c17_i32_75 = arith.constant 17 : i32
    %126 = tpu.dynamic_rotate %123 by %c17_i32_75 dim 1 : vector<8x384xf32>, i32 -> vector<8x384xf32>
    %c1_i32_76 = arith.constant 1 : i32
    %127 = tpu.dynamic_rotate %123 by %c1_i32_76 dim 1 : vector<8x384xf32>, i32 -> vector<8x384xf32>
    %c383_i32_77 = arith.constant 383 : i32
    %128 = tpu.dynamic_rotate %123 by %c383_i32_77 dim 1 : vector<8x384xf32>, i32 -> vector<8x384xf32>
    %c367_i32_78 = arith.constant 367 : i32
    %129 = tpu.dynamic_rotate %123 by %c367_i32_78 dim 1 : vector<8x384xf32>, i32 -> vector<8x384xf32>
    %c366_i32_79 = arith.constant 366 : i32
    %130 = tpu.dynamic_rotate %123 by %c366_i32_79 dim 1 : vector<8x384xf32>, i32 -> vector<8x384xf32>
    %c365_i32_80 = arith.constant 365 : i32
    %131 = tpu.dynamic_rotate %123 by %c365_i32_80 dim 1 : vector<8x384xf32>, i32 -> vector<8x384xf32>
    %132 = tpu.concatenate %124, %125, %126, %127, %123, %128, %129, %130, %131 in 0 : vector<8x384xf32>, vector<8x384xf32>, vector<8x384xf32>, vector<8x384xf32>, vector<8x384xf32>, vector<8x384xf32>, vector<8x384xf32>, vector<8x384xf32>, vector<8x384xf32> -> vector<72x384xf32>
    %133 = arith.truncf %132 : vector<72x384xf32> to vector<72x384xbf16>
    %c5 = arith.constant 5 : index
    %c0_81 = arith.constant 0 : index
    %c0_82 = arith.constant 0 : index
    %134 = vector.load %arg5[%c5, %c0_81, %c0_82] : memref<6x8x72xbf16, #tpu.memory_space<vmem>>, vector<1x8x72xbf16>
    %135 = vector.shape_cast %134 : vector<1x8x72xbf16> to vector<8x72xbf16>
    %cst_83 = arith.constant dense<0.000000e+00> : vector<8x384xf32>
    %136 = tpu.matmul %135, %133, %cst_83 {dimension_numbers = #tpu.dot_dimension_numbers<[1], [0], [0], [1], [0, 0, 1, 1], [], []>} : vector<8x72xbf16>, vector<72x384xbf16>, vector<8x384xf32> -> vector<8x384xf32>
    %c5_84 = arith.constant 5 : index
    %c0_85 = arith.constant 0 : index
    %c0_86 = arith.constant 0 : index
    %137 = vector.load %arg6[%c5_84, %c0_85, %c0_86] : memref<6x8x1xf32, #tpu.memory_space<vmem>>, vector<1x8x1xf32>
    %138 = vector.shape_cast %137 : vector<1x8x1xf32> to vector<8x1xf32>
    %139 = vector.broadcast %138 : vector<8x1xf32> to vector<8x384xf32>
    %140 = arith.addf %136, %139 : vector<8x384xf32>
    %141 = vector.broadcast %1 : vector<1x384xf32> to vector<8x384xf32>
    %142 = arith.mulf %140, %141 : vector<8x384xf32>
    %143 = vector.extract_strided_slice %73 {offsets = [0, 0], sizes = [1, 384], strides = [1, 1]} : vector<8x384xf32> to vector<1x384xf32>
    %c0_87 = arith.constant 0 : index
    %c0_88 = arith.constant 0 : index
    %c0_89 = arith.constant 0 : index
    %144 = vector.load %arg7[%c0_87, %c0_88, %c0_89] : memref<1x8x384xf32, #tpu.memory_space<vmem>>, vector<1x1x384xf32>
    %145 = vector.shape_cast %144 : vector<1x1x384xf32> to vector<1x384xf32>
    %146 = vector.shape_cast %143 : vector<1x384xf32> to vector<1x1x384xf32>
    tpu.vector_store %arg7[%c0_87, %c0_88, %c0_89], %146 {strides = array<i32>} : memref<1x8x384xf32, #tpu.memory_space<vmem>>, vector<1x1x384xf32>,
    %147 = vector.extract_strided_slice %142 {offsets = [0, 0], sizes = [2, 384], strides = [1, 1]} : vector<8x384xf32> to vector<2x384xf32>
    %c0_90 = arith.constant 0 : index
    %c1_91 = arith.constant 1 : index
    %c0_92 = arith.constant 0 : index
    %148 = vector.load %arg7[%c0_90, %c1_91, %c0_92] : memref<1x8x384xf32, #tpu.memory_space<vmem>>, vector<1x2x384xf32>
    %149 = vector.shape_cast %148 : vector<1x2x384xf32> to vector<2x384xf32>
    %150 = vector.shape_cast %147 : vector<2x384xf32> to vector<1x2x384xf32>
    tpu.vector_store %arg7[%c0_90, %c1_91, %c0_92], %150 {strides = array<i32>} : memref<1x8x384xf32, #tpu.memory_space<vmem>>, vector<1x2x384xf32>,
    %cst_93 = arith.constant 0.000000e+00 : f32
    %151 = vector.broadcast %cst_93 : f32 to vector<4x384xf32>
    %c0_94 = arith.constant 0 : index
    %c4_95 = arith.constant 4 : index
    %c0_96 = arith.constant 0 : index
    %152 = vector.load %arg7[%c0_94, %c4_95, %c0_96] : memref<1x8x384xf32, #tpu.memory_space<vmem>>, vector<1x4x384xf32>
    %153 = vector.shape_cast %152 : vector<1x4x384xf32> to vector<4x384xf32>
    %154 = vector.shape_cast %151 : vector<4x384xf32> to vector<1x4x384xf32>
    tpu.vector_store %arg7[%c0_94, %c4_95, %c0_96], %154 {strides = array<i32>} : memref<1x8x384xf32, #tpu.memory_space<vmem>>, vector<1x4x384xf32>,
    %155 = tpu.iota {dimensions = array<i32: 0>} : vector<18x384xi32>
    %156 = tpu.iota {dimensions = array<i32: 0>} : vector<18x384xi32>
    %c0_97 = arith.constant 0 : index
    %c0_98 = arith.constant 0 : index
    %c0_99 = arith.constant 0 : index
    %157 = vector.load %arg2[%c0_97, %c0_98, %c0_99] : memref<1x18x18xf32, #tpu.memory_space<vmem>>, vector<1x18x18xf32>
    %158 = vector.shape_cast %157 : vector<1x18x18xf32> to vector<18x18xf32>
    %cst_100 = arith.constant 1.000000e+00 : f32
    %159 = vector.broadcast %cst_100 : f32 to vector<18x18xf32>
    %160 = arith.addf %158, %159 : vector<18x18xf32>
    %cst_101 = arith.constant 5.000000e-01 : f32
    %161 = vector.broadcast %cst_101 : f32 to vector<18x18xf32>
    %162 = arith.mulf %160, %161 : vector<18x18xf32>
    %163 = arith.truncf %162 : vector<18x18xf32> to vector<18x18xbf16>
    %164 = vector.extract_strided_slice %142 {offsets = [0, 0], sizes = [1, 384], strides = [1, 1]} : vector<8x384xf32> to vector<1x384xf32>
    %165 = vector.extract_strided_slice %142 {offsets = [1, 0], sizes = [1, 384], strides = [1, 1]} : vector<8x384xf32> to vector<1x384xf32>
    %166 = arith.addf %164, %2 : vector<1x384xf32>
    %167 = arith.addf %165, %3 : vector<1x384xf32>
    %168 = math.floor %166 : vector<1x384xf32>
    %169 = math.floor %167 : vector<1x384xf32>
    %170 = arith.subf %166, %168 : vector<1x384xf32>
    %171 = arith.subf %167, %169 : vector<1x384xf32>
    %172 = arith.fptosi %168 : vector<1x384xf32> to vector<1x384xi32>
    %c0_i32 = arith.constant 0 : i32
    %c17_i32_102 = arith.constant 17 : i32
    %173 = vector.broadcast %c0_i32 : i32 to vector<1x384xi32>
    %174 = arith.maxsi %173, %172 : vector<1x384xi32>
    %175 = vector.broadcast %c17_i32_102 : i32 to vector<1x384xi32>
    %176 = arith.minsi %175, %174 : vector<1x384xi32>
    %177 = arith.fptosi %168 : vector<1x384xf32> to vector<1x384xi32>
    %c1_i32_103 = arith.constant 1 : i32
    %178 = vector.broadcast %c1_i32_103 : i32 to vector<1x384xi32>
    %179 = arith.addi %177, %178 : vector<1x384xi32>
    %c0_i32_104 = arith.constant 0 : i32
    %c17_i32_105 = arith.constant 17 : i32
    %180 = vector.broadcast %c0_i32_104 : i32 to vector<1x384xi32>
    %181 = arith.maxsi %180, %179 : vector<1x384xi32>
    %182 = vector.broadcast %c17_i32_105 : i32 to vector<1x384xi32>
    %183 = arith.minsi %182, %181 : vector<1x384xi32>
    %184 = arith.fptosi %169 : vector<1x384xf32> to vector<1x384xi32>
    %c0_i32_106 = arith.constant 0 : i32
    %c17_i32_107 = arith.constant 17 : i32
    %185 = vector.broadcast %c0_i32_106 : i32 to vector<1x384xi32>
    %186 = arith.maxsi %185, %184 : vector<1x384xi32>
    %187 = vector.broadcast %c17_i32_107 : i32 to vector<1x384xi32>
    %188 = arith.minsi %187, %186 : vector<1x384xi32>
    %189 = arith.fptosi %169 : vector<1x384xf32> to vector<1x384xi32>
    %c1_i32_108 = arith.constant 1 : i32
    %190 = vector.broadcast %c1_i32_108 : i32 to vector<1x384xi32>
    %191 = arith.addi %189, %190 : vector<1x384xi32>
    %c0_i32_109 = arith.constant 0 : i32
    %c17_i32_110 = arith.constant 17 : i32
    %192 = vector.broadcast %c0_i32_109 : i32 to vector<1x384xi32>
    %193 = arith.maxsi %192, %191 : vector<1x384xi32>
    %194 = vector.broadcast %c17_i32_110 : i32 to vector<1x384xi32>
    %195 = arith.minsi %194, %193 : vector<1x384xi32>
    %196 = vector.broadcast %176 : vector<1x384xi32> to vector<18x384xi32>
    %197 = arith.cmpi eq, %155, %196 : vector<18x384xi32>
    %198 = arith.extui %197 : vector<18x384xi1> to vector<18x384xi32>
    %199 = arith.sitofp %198 : vector<18x384xi32> to vector<18x384xf32>
    %cst_111 = arith.constant 1.000000e+00 : f32
    %200 = vector.broadcast %cst_111 : f32 to vector<1x384xf32>
    %201 = arith.subf %200, %170 : vector<1x384xf32>
    %202 = vector.broadcast %201 : vector<1x384xf32> to vector<18x384xf32>
    %203 = arith.mulf %199, %202 : vector<18x384xf32>
    %204 = vector.broadcast %183 : vector<1x384xi32> to vector<18x384xi32>
    %205 = arith.cmpi eq, %155, %204 : vector<18x384xi32>
    %206 = arith.extui %205 : vector<18x384xi1> to vector<18x384xi32>
    %207 = arith.sitofp %206 : vector<18x384xi32> to vector<18x384xf32>
    %208 = vector.broadcast %170 : vector<1x384xf32> to vector<18x384xf32>
    %209 = arith.mulf %207, %208 : vector<18x384xf32>
    %210 = arith.addf %203, %209 : vector<18x384xf32>
    %211 = vector.broadcast %188 : vector<1x384xi32> to vector<18x384xi32>
    %212 = arith.cmpi eq, %156, %211 : vector<18x384xi32>
    %213 = arith.extui %212 : vector<18x384xi1> to vector<18x384xi32>
    %214 = arith.sitofp %213 : vector<18x384xi32> to vector<18x384xf32>
    %cst_112 = arith.constant 1.000000e+00 : f32
    %215 = vector.broadcast %cst_112 : f32 to vector<1x384xf32>
    %216 = arith.subf %215, %171 : vector<1x384xf32>
    %217 = vector.broadcast %216 : vector<1x384xf32> to vector<18x384xf32>
    %218 = arith.mulf %214, %217 : vector<18x384xf32>
    %219 = vector.broadcast %195 : vector<1x384xi32> to vector<18x384xi32>
    %220 = arith.cmpi eq, %156, %219 : vector<18x384xi32>
    %221 = arith.extui %220 : vector<18x384xi1> to vector<18x384xi32>
    %222 = arith.sitofp %221 : vector<18x384xi32> to vector<18x384xf32>
    %223 = vector.broadcast %171 : vector<1x384xf32> to vector<18x384xf32>
    %224 = arith.mulf %222, %223 : vector<18x384xf32>
    %225 = arith.addf %218, %224 : vector<18x384xf32>
    %226 = arith.truncf %210 : vector<18x384xf32> to vector<18x384xbf16>
    %cst_113 = arith.constant dense<0.000000e+00> : vector<18x384xf32>
    %227 = tpu.matmul %163, %226, %cst_113 {dimension_numbers = #tpu.dot_dimension_numbers<[1], [0], [0], [1], [0, 0, 1, 1], [], []>} : vector<18x18xbf16>, vector<18x384xbf16>, vector<18x384xf32> -> vector<18x384xf32>
    %228 = arith.mulf %227, %225 : vector<18x384xf32>
    %cst_114 = arith.constant dense<0.000000e+00> : vector<384xf32>
    %229 = vector.multi_reduction <add>, %228, %cst_114 [0] : vector<18x384xf32> to vector<384xf32>
    %230 = vector.shape_cast %229 : vector<384xf32> to vector<1x384xf32>
    %231 = arith.mulf %230, %4 : vector<1x384xf32>
    %c0_115 = arith.constant 0 : index
    %c3_116 = arith.constant 3 : index
    %c0_117 = arith.constant 0 : index
    %232 = vector.load %arg7[%c0_115, %c3_116, %c0_117] : memref<1x8x384xf32, #tpu.memory_space<vmem>>, vector<1x1x384xf32>
    %233 = vector.shape_cast %232 : vector<1x1x384xf32> to vector<1x384xf32>
    %234 = vector.shape_cast %231 : vector<1x384xf32> to vector<1x1x384xf32>
    tpu.vector_store %arg7[%c0_115, %c3_116, %c0_117], %234 {strides = array<i32>} : memref<1x8x384xf32, #tpu.memory_space<vmem>>, vector<1x1x384xf32>,
    return
  }
  func.func @transform_0(%arg0: i32) -> (i32, i32, i32) {
    %c0_i32 = arith.constant 0 : i32
    %c0_i32_0 = arith.constant 0 : i32
    %c0_i32_1 = arith.constant 0 : i32
    return %arg0, %c0_i32, %c0_i32_0 : i32, i32, i32
  }
  func.func @transform_1(%arg0: i32) -> (i32, i32, i32) {
    %c0_i32 = arith.constant 0 : i32
    %c0_i32_0 = arith.constant 0 : i32
    %c0_i32_1 = arith.constant 0 : i32
    return %arg0, %c0_i32, %c0_i32_0 : i32, i32, i32
  }
  func.func @transform_2(%arg0: i32) -> (i32, i32, i32) {
    %c0_i32 = arith.constant 0 : i32
    %c0_i32_0 = arith.constant 0 : i32
    %c0_i32_1 = arith.constant 0 : i32
    return %arg0, %c0_i32, %c0_i32_0 : i32, i32, i32
  }
  func.func @transform_3(%arg0: i32) -> (i32, i32) {
    %c0_i32 = arith.constant 0 : i32
    %c0_i32_0 = arith.constant 0 : i32
    %c0_i32_1 = arith.constant 0 : i32
    return %c0_i32, %c0_i32_0 : i32, i32
  }
  func.func @transform_4(%arg0: i32) -> (i32, i32, i32) {
    %c0_i32 = arith.constant 0 : i32
    %c0_i32_0 = arith.constant 0 : i32
    %c0_i32_1 = arith.constant 0 : i32
    %c0_i32_2 = arith.constant 0 : i32
    return %c0_i32, %c0_i32_0, %c0_i32_1 : i32, i32, i32
  }
  func.func @transform_5(%arg0: i32) -> (i32, i32, i32) {
    %c0_i32 = arith.constant 0 : i32
    %c0_i32_0 = arith.constant 0 : i32
    %c0_i32_1 = arith.constant 0 : i32
    %c0_i32_2 = arith.constant 0 : i32
    return %c0_i32, %c0_i32_0, %c0_i32_1 : i32, i32, i32
  }
  func.func @transform_6(%arg0: i32) -> (i32, i32, i32) {
    %c0_i32 = arith.constant 0 : i32
    %c0_i32_0 = arith.constant 0 : i32
    %c0_i32_1 = arith.constant 0 : i32
    return %arg0, %c0_i32, %c0_i32_0 : i32, i32, i32
  }
}

</mosaic_0001>

<bundles_post_ra>
// kernel: tile.11
= control target key start
LH: loop header
LB: loop body
LE: loop exit
PB: predicated region body
PF: predicated region fallthrough
CT: control target
= control target key end

     0   :  { %vm9_vm0 = vcmask 15360   ;;  %vm22_vm1 = vcmask 31744   ;;  %s191_s14 = smov 126   ;;  %s192_s15 = smov 108   ;;  %vm3_vm2 = vcmask 146432   ;;  %vm13_vm3 = vcmask 130048   ;;  %s287_s0 = inlined_call_operand.vmem [shape: f32[18,18], index: 0, kind: input, shape index: {}]   ;;  %s288_s1 = inlined_call_operand.vmem [shape: f32[1,324], index: 1, kind: output, shape index: {}]  }
   0x1   :  { %v153_v0 = vld [vmem:[%s287_s0 + $0x7] sm:$0x1]   ;;  %v157_v3 = vld [vmem:[%s287_s0 + $0x6] sm:$0x1]   ;;  %v155_v4 = vld [vmem:[%s287_s0 + $0xe] sm:$0x1]  }
   0x2   :  { %v154_v1 = vld [vmem:[%s287_s0 + $0x7] sm:$0x1]   ;;  %34 = vrot.lane.b32.xlu1 %v157_v3, %s192_s15  ;;  %v156_v5 = vld [vmem:[%s287_s0 + $0xe] sm:$0x1]   ;;  %v158_v7 = vld [vmem:[%s287_s0 + $0xd] sm:$0x1]  }
   0x3   :  { %v10_v2 = vsel %vm9_vm0, %v154_v1, %v153_v0  ;;  %v23_v6 = vsel %vm22_vm1, %v156_v5, %v155_v4  ;;  %s193_s20 = smov 124   ;;  %s194_s21 = smov 106   ;;  %v159_v8 = vld [vmem:[%s287_s0 + $0x5] sm:$0x1]   ;;  %v160_v9 = vld [vmem:[%s287_s0 + $0xc] sm:$0x1]  }
   0x4   :  { %11 = vrot.lane.b32.xlu0 %v10_v2, %s191_s14  ;;  %s195_s26 = smov 90   ;;  %s196_s27 = smov 88   ;;  %v2_v10 = vld [vmem:[%s287_s0] sm:$0x1]   ;;  %v161_v11 = vld [vmem:[%s287_s0 + $0x4] sm:$0x1]  }
   0x5   :  { %v162_v12 = vld [vmem:[%s287_s0 + $0xb] sm:$0x1]   ;;  %4 = vst.msk [vmem:[#allocation0] sm:$0x1] %vm3_vm2, %v2_v10   ;;  %s197_s5 = smov 72   ;;  %s198_s6 = smov 70  }
   0x6   :  { %40 = vrot.lane.b32.xlu1 %v158_v7, %s194_s21  ;;  %v163_v13 = vld [vmem:[%s287_s0 + $0x3] sm:$0x1]   ;;  %v164_v14 = vld [vmem:[%s287_s0 + $0xa] sm:$0x1]   ;;  %s199_s11 = smov 54   ;;  %s200_s12 = smov 52  }
   0x7   :  { %v165_v15 = vld [vmem:[%s287_s0 + $0x11] sm:$0x1]   ;;  %v166_v16 = vld [vmem:[%s287_s0 + $0x2] sm:$0x1]   ;;  %s201_s17 = smov 50   ;;  %s202_s18 = smov 36  }
   0x8   :  { %24 = vrot.lane.b32.xlu0 %v23_v6, %s193_s20  ;;  %v167_v17 = vld [vmem:[%s287_s0 + $0x9] sm:$0x1]   ;;  %v168_v18 = vld [vmem:[%s287_s0 + $0x10] sm:$0x1]   ;;  %s203_s23 = smov 34   ;;  %s204_s24 = smov 32  }
   0x9   :  { %v169_v19 = vld [vmem:[%s287_s0 + $0x1] sm:$0x1]   ;;  %v170_v20 = vld [vmem:[%s287_s0 + $0x8] sm:$0x1]   ;;  %s205_s29 = smov 18   ;;  %s206_s30 = smov 16  }
   0xa   :  { %53 = vrot.lane.b32.xlu1 %v160_v9, %s196_s27  ;;  %v171_v21 = vld [vmem:[%s287_s0 + $0xf] sm:$0x1]   ;;  %s207_s0 = smov 14   ;;  %vm16_vm4 = vcmask 1048560   ;;  %vm36_vm5 = vcmask 1032032   ;;  %vm26_vm6 = vcmask 113664  }
   0xb   :  { %vm29_vm7 = vcmask 1048544   ;;  %vm42_vm8 = vcmask 1015632   ;;  %vm49_vm9 = vcmask 884432   ;;  %vm55_vm10 = vcmask 868032  }
   0xc   :  { %47 = vrot.lane.b32.xlu0 %v159_v8, %s195_s26  ;;  %vm62_vm11 = vcmask 736832   ;;  %vm68_vm12 = vcmask 720432   ;;  %vm75_vm13 = vcmask 589232   ;;  %vm81_vm14 = vcmask 572832  }
   0xd   :  { %vm88_vm15 = vcmask 556432   ;;  %vm95_vm0 = vcmask 441632   ;;  %vm101_vm1 = vcmask 425232   ;;  %vm108_vm2 = vcmask 408832  }
   0xe   :  { %66 = vrot.lane.b32.xlu1 %v162_v12, %s198_s6 }
  0x10   :  { %60 = vrot.lane.b32.xlu0 %v161_v11, %s197_s5 }
  0x12   :  { %79 = vrot.lane.b32.xlu1 %v164_v14, %s200_s12 }
  0x14   :  { %73 = vrot.lane.b32.xlu0 %v163_v13, %s199_s11 }
  0x16   :  { %93 = vrot.lane.b32.xlu1 %v166_v16, %s202_s18 }
  0x18   :  { %86 = vrot.lane.b32.xlu0 %v165_v15, %s201_s17 }
  0x1a   :  { %106 = vrot.lane.b32.xlu1 %v168_v18, %s204_s24 }
  0x1c   :  { %99 = vrot.lane.b32.xlu0 %v167_v17, %s203_s23 }
  0x1e   :  { %119 = vrot.lane.b32.xlu1 %v170_v20, %s206_s30 }
  0x20   :  { %113 = vrot.lane.b32.xlu0 %v169_v19, %s205_s29 }
  0x24   :  { %126 = vrot.lane.b32.xlu0 %v171_v21, %s207_s0 }
  0x74   :  { %v35_v23 = vpop.permute.xlu1 %34  }
  0x76   :  { %v12_v22 = vpop.permute.xlu0 %11  }
  0x77   :  { %15 = vst.msk [vmem:[#allocation0 + $0x8] sm:$0x1] %vm13_vm3, %v12_v22   ;;  %vm115_vm3 = vcmask 294032  }
  0x78   :  { %17 = vst.msk [vmem:[#allocation0] sm:$0x1] %vm16_vm4, %v12_v22   ;;  %v41_v25 = vpop.permute.xlu1 %40   ;;  %vm121_vm4 = vcmask 277632  }
  0x79   :  { %37 = vst.msk [vmem:[#allocation0] sm:$0x1] %vm36_vm5, %v35_v23   ;;  %vm128_vm5 = vcmask 261232  }
  0x7a   :  { %v25_v24 = vpop.permute.xlu0 %24  }
  0x7b   :  { %28 = vst.msk [vmem:[#allocation0 + $0x10] sm:$0x1] %vm26_vm6, %v25_v24  }
  0x7c   :  { %31 = vst.msk [vmem:[#allocation0 + $0x8] sm:$0x1] %vm29_vm7, %v25_v24   ;;  %v54_v27 = vpop.permute.xlu1 %53  }
  0x7d   :  { %44 = vst.msk [vmem:[#allocation0 + $0x8] sm:$0x1] %vm42_vm8, %v41_v25  }
  0x7e   :  { %v48_v26 = vpop.permute.xlu0 %47   ;;  %57 = vst.msk [vmem:[#allocation0 + $0x8] sm:$0x1] %vm55_vm10, %v54_v27  }
  0x7f   :  { %50 = vst.msk [vmem:[#allocation0] sm:$0x1] %vm49_vm9, %v48_v26  }
  0x80   :  { %v67_v29 = vpop.permute.xlu1 %66  }
  0x81   :  { %70 = vst.msk [vmem:[#allocation0 + $0x8] sm:$0x1] %vm68_vm12, %v67_v29  }
  0x82   :  { %v61_v28 = vpop.permute.xlu0 %60  }
  0x83   :  { %63 = vst.msk [vmem:[#allocation0] sm:$0x1] %vm62_vm11, %v61_v28  }
  0x84   :  { %v80_v31 = vpop.permute.xlu1 %79  }
  0x85   :  { %83 = vst.msk [vmem:[#allocation0 + $0x8] sm:$0x1] %vm81_vm14, %v80_v31  }
  0x86   :  { %v74_v30 = vpop.permute.xlu0 %73  }
  0x87   :  { %76 = vst.msk [vmem:[#allocation0] sm:$0x1] %vm75_vm13, %v74_v30  }
  0x88   :  { %v94_v33 = vpop.permute.xlu1 %93  }
  0x89   :  { %96 = vst.msk [vmem:[#allocation0] sm:$0x1] %vm95_vm0, %v94_v33  }
  0x8a   :  { %v87_v32 = vpop.permute.xlu0 %86  }
  0x8b   :  { %90 = vst.msk [vmem:[#allocation0 + $0x10] sm:$0x1] %vm88_vm15, %v87_v32  }
  0x8c   :  { %v107_v35 = vpop.permute.xlu1 %106  }
  0x8d   :  { %110 = vst.msk [vmem:[#allocation0 + $0x10] sm:$0x1] %vm108_vm2, %v107_v35  }
  0x8e   :  { %v100_v34 = vpop.permute.xlu0 %99  }
  0x8f   :  { %103 = vst.msk [vmem:[#allocation0 + $0x8] sm:$0x1] %vm101_vm1, %v100_v34  }
  0x90   :  { %v120_v37 = vpop.permute.xlu1 %119  }
  0x91   :  { %123 = vst.msk [vmem:[#allocation0 + $0x8] sm:$0x1] %vm121_vm4, %v120_v37  }
  0x92   :  { %v114_v36 = vpop.permute.xlu0 %113  }
  0x93   :  { %116 = vst.msk [vmem:[#allocation0] sm:$0x1] %vm115_vm3, %v114_v36  }
  0x96   :  { %v127_v38 = vpop.permute.xlu0 %126  }
  0x97   :  { %130 = vst.msk [vmem:[#allocation0 + $0x10] sm:$0x1] %vm128_vm5, %v127_v38  }
  0x98   :  { %v140_v40 = vld [vmem:[#allocation0 + $0x8] sm:$0x1] }
  0x99   :  { %172 = vst [vmem:[%s288_s1 + $0x1] sm:$0x1] %v140_v40 }
  0x9a   :  { %v135_v39 = vld [vmem:[#allocation0] sm:$0x1] }
  0x9b   :  { %138 = vst [vmem:[%s288_s1] sm:$0x1] %v135_v39 }
  0x9e   :  { %v146_v41 = vld [vmem:[#allocation0 + $0x10] sm:$0x1] }
  0x9f   :  { %173 = vst [vmem:[%s288_s1 + $0x2] sm:$0x1] %v146_v41 }

// kernel: model_forward.1
= control target key start
LH: loop header
LB: loop body
LE: loop exit
PB: predicated region body
PF: predicated region fallthrough
CT: control target
= control target key end

     0   :  { %s2772_s21 = smov 0   ;;  %s3762_s0 = inlined_call_operand.vmem [shape: f32[2,8,384], index: 0, kind: input, shape index: {}]   ;;  %s3763_s1 = inlined_call_operand.vmem [shape: f32[2,18,18], index: 1, kind: input, shape index: {}]   ;;  %s3764_s2 = inlined_call_operand.vmem [shape: f32[2,8,1], index: 2, kind: input, shape index: {}]   ;;  %s3765_s3 = inlined_call_operand.vmem [shape: f32[3,384], index: 3, kind: input, shape index: {}]   ;;  %s3766_s4 = inlined_call_operand.vmem [shape: bf16[6,8,72], index: 4, kind: input, shape index: {}]   ;;  %s3767_s5 = inlined_call_operand.vmem [shape: f32[6,8,1], index: 5, kind: input, shape index: {}]   ;;  %s3768_s6 = inlined_call_operand.vmem [shape: f32[2,8,384], index: 6, kind: output, shape index: {}]  }
   0x1 LB: > { %s2225_s22 = sadd.s32 4294967295, %s2723_s21   ;;  %p2229_p0 = scmp.ge.s32.totalorder %s2723_s21, 1  ;;  %s2723_s21 = sphi %s2772_s21, %s16_s21  }
   0x2   : > { %p231_p1 = scmp.lt.s32.totalorder %s2723_s21, 3 }
   0x4   : > { %p232_p2 = pnand %p2229_p0, %p231_p1 }
   0x5   : > { %p270_p3 = scmp.lt.s32.totalorder (!%p232_p2), %s2225_s22, 1  ;;  %s2726_s27 = smov (!%p232_p2), 111  }
   0x6   : > { %235 = sbr.rel (%p232_p2) target bundleno = 2385 (0x951), region = 44  ;;  %s2727_s28 = smov (!%p232_p2), 109  }
   0x7   : > { %s2728_s29 = smov (!%p232_p2), 110   ;;  %s2729_s30 = smov (!%p232_p2), 127  }
   0x8   : > { %s2730_s7 = smov (!%p232_p2), 1   ;;  %s2731_s8 = smov (!%p232_p2), 17  }
   0x9   : > { %s2734_s10 = smov (!%p232_p2), 18   ;;  %s2735_s11 = smov (!%p232_p2), 19  }
   0xb   : > { %s3772_s22 = smov (!%p270_p3, %s2225_s22), 1  ;;  %v2725_v0 = vmov 0.0   ;;  %v2732_v6 = vmov 0   ;;  %vm2733_vm0 = vmmov 0   ;;  %v393_v7 = vld [vmem:[%s3767_s5] sm:$0xff]  ;;  %v301_v9 = vlaneseq }
   0xc   : > { %2347 = vmatprep.subr.bf16.mxu1 %v2725_v0  ;;  %s2784_s23 = smul.u32 24, %s3772_s22  ;;  %445 = vmatprep.mubr.bf16.mxu0 %v2732_v6  ;;  %s2232_s9 = sshll.u32 %s3772_s22, 3  ;;  %vm403_vm4 = vcmask 1043456   ;;  %vm399_vm10 = vcmask 588800   ;;  %vm1960_vm13 = vcmask 146432  }
   0xd   : > { %2357 = vmatprep.mubr.msk.bf16.mxu1 %vm2733_vm0, %v2725_v0  ;;  %2513 = vset.pattern.permute.xlu0 %v2732_v6  ;;  %s283_s14 = scalar_lea.vmem %s3764_s2, %s2232_s9  ;;  %v2837_v10 = vand.u32 127, %v301_v9  ;;  %vm3199_vm12 = vcmp.lt.s32.totalorder %v301_v9, 384 }
   0xe   : > { %s274_s26 = scalar_lea.vmem %s3762_s0, %s2784_s23  ;;  %2514 = vset.pattern.permute.xlu1 %v2732_v6  ;;  %v529_v8 = vld [vmem:[%s283_s14] sm:$0xff]  ;;  %s3161_s19 = scalar_lea.vmem %s3768_s6, %s2784_s23 }
   0xf   : > { %v2790_v1 = vld [vmem:[%s274_s26 + $0x8] sm:$0xff]  ;;  %v2792_v2 = vld [vmem:[%s274_s26 + $0x10] sm:$0xff]  ;;  %v2794_v3 = vld [vmem:[%s274_s26] sm:$0xff]  ;;  %vm373_vm1 = vcmp.lt.s32.totalorder %v2837_v10, 109  ;;  %vm363_vm2 = vcmp.lt.s32.totalorder %v2837_v10, 110  ;;  %vm353_vm3 = vcmp.lt.s32.totalorder %v2837_v10, 111 }
  0x10   : > { %v2478_v4 = vpack.i.bf16 %v2792_v2, %v2790_v1  ;;  %v2473_v5 = vpack.i.bf16 %v2790_v1, %v2794_v3  ;;  %vm343_vm5 = vcmp.lt.s32.totalorder %v2837_v10, 127  ;;  %vm333_vm6 = vcmp.lt.s32.totalorder %v2837_v10, 1  ;;  %1566 = vst [vmem:[%s3161_s19] sm:$0xf0] %v2725_v0  ;;  %1567 = vst [vmem:[%s3161_s19 + $0x8] sm:$0xf0] %v2725_v0 }
  0x11   : > { %vm323_vm7 = vcmp.lt.s32.totalorder %v2837_v10, 17  ;;  %vm313_vm8 = vcmp.lt.s32.totalorder %v2837_v10, 18  ;;  %vm303_vm9 = vcmp.lt.s32.totalorder %v2837_v10, 19  ;;  %1568 = vst [vmem:[%s3161_s19 + $0x10] sm:$0xf0] %v2725_v0 }
  0x12   : > { %2479 = vrot.lane.b32.xlu1 %v2478_v4, %s2726_s27  ;;  %2474 = vrot.lane.b32.xlu0 %v2473_v5, %s2727_s28 }
  0x16   : > { %2484 = vrot.lane.b32.xlu1 %v2478_v4, %s2728_s29  ;;  %371 = vrot.lane.b32.xlu0 %v2792_v2, %s2727_s28 }
  0x1a   : > { %357 = vrot.lane.b32.xlu1 %v2794_v3, %s2728_s29  ;;  %347 = vrot.lane.b32.xlu0 %v2794_v3, %s2726_s27 }
  0x1e   : > { %337 = vrot.lane.b32.xlu1 %v2794_v3, %s2729_s30  ;;  %2489 = vrot.lane.b32.xlu0 %v2478_v4, %s2729_s30 }
  0x22   : > { %2499 = vrot.lane.b32.xlu1 %v2473_v5, %s2730_s7  ;;  %2494 = vrot.lane.b32.xlu0 %v2473_v5, %s2731_s8 }
  0x26   : > { %331 = vrot.lane.b32.xlu1 %v2792_v2, %s2730_s7  ;;  %321 = vrot.lane.b32.xlu0 %v2792_v2, %s2731_s8 }
  0x2a   : > { %2509 = vrot.lane.b32.xlu1 %v2473_v5, %s2734_s10  ;;  %2504 = vrot.lane.b32.xlu0 %v2473_v5, %s2735_s11 }
  0x2e   : > { %311 = vrot.lane.b32.xlu1 %v2792_v2, %s2734_s10  ;;  %299 = vrot.lane.b32.xlu0 %v2792_v2, %s2735_s11 }
  0x32   : > { %396 = vperm.xlu0 %2513, %v393_v7   ;;  %532 = vperm.xlu1 %2514, %v529_v8  }
  0x84   : > { %v2480_v11 = vpop.permute.xlu1 %2479  ;;  %v2475_v12 = vpop.permute.xlu0 %2474 }
  0x85   : > { %v2477_v13 = vunpack.i.h.bf16 %v2475_v12  ;;  %v2476_v14 = vunpack.i.l.bf16 %v2475_v12  ;;  %v2482_v15 = vunpack.i.h.bf16 %v2480_v11  ;;  %v2481_v16 = vunpack.i.l.bf16 %v2480_v11 }
  0x87   : > { %v375_v17 = vsel %vm373_vm1, %v2476_v14, %v2477_v13  ;;  %v354_v27 = vsel %vm353_vm3, %v2481_v16, %v2482_v15 }
  0x88   : > { %v2485_v18 = vpop.permute.xlu1 %2484  ;;  %v372_v19 = vpop.permute.xlu0 %371  ;;  %v389_v20 = vpack.c.bf16 %v375_v17, %v375_v17 }
  0x89   : > { %v2487_v21 = vunpack.i.h.bf16 %v2485_v18  ;;  %v2486_v22 = vunpack.i.l.bf16 %v2485_v18  ;;  %v374_v23 = vsel %vm373_vm1, %v2477_v13, %v372_v19  ;;  %v376_v24 = vsel %vm373_vm1, %v372_v19, %v2476_v14 }
  0x8a   : > { %v390_v25 = vpack.c.bf16 %v374_v23, %v374_v23  ;;  %v391_v26 = vpack.c.bf16 %v376_v24, %v376_v24  ;;  %v405_v31 = vsel %vm403_vm4, %v389_v20, 0 }
  0x8b   : > { %v364_v28 = vsel %vm363_vm2, %v2486_v22, %v2487_v21 }
  0x8c   : > { %v358_v29 = vpop.permute.xlu1 %357  ;;  %v348_v30 = vpop.permute.xlu0 %347  ;;  %2234 = vmatprep.subr.msk.bf16.mxu0 %vm403_vm4, %v390_v25  ;;  %v411_v32 = vsel %vm403_vm4, %v391_v26, 0  ;;  %v387_v33 = vpack.c.bf16 %v364_v28, %v354_v27  ;;  %v392_v27 = vld [vmem:[%s3766_s4] sm:$0xf]  ;;  %v2915_v28 = vshrl.u32 %v301_v9, 7  ;;  %v2249_v9 = vld [vmem:[%s3767_s5 + $0x18] sm:$0xff] }
  0x8d   : > { %v365_v34 = vsel %vm363_vm2, %v358_v29, %v2486_v22  ;;  %v366_v35 = vsel %vm363_vm2, %v2487_v21, %v358_v29  ;;  %v355_v36 = vsel %vm353_vm3, %v348_v30, %v2481_v16  ;;  %v356_v37 = vsel %vm353_vm3, %v2482_v15, %v348_v30  ;;  %420 = vmatpush1.bf16.msra.mxu0 %v405_v31  ;;  %v290_v30 = vld [vmem:[%s3765_s3] sm:$0x77]  ;;  %v291_v31 = vld [vmem:[%s3765_s3 + $0x8] sm:$0x7] }
  0x8e   : > { %v386_v38 = vpack.c.bf16 %v365_v34, %v355_v36  ;;  %v388_v39 = vpack.c.bf16 %v366_v35, %v356_v37  ;;  %2348 = vmatpush3.bf16.msra.mxu1 %v411_v32  ;;  %421 = vmatprep.subr.bf16.mxu0 %v387_v33  ;;  %v501_v29 = vsub.s32 2, %v2915_v28  ;;  %v505_v32 = vsub.s32 6, %v2915_v28 }
  0x8f   : > { %2349 = vmatprep.subr.bf16.mxu1 %v2725_v0  ;;  %vm930_vm11 = vcmp.eq.s32.totalorder %v2915_v28, 2 }
  0x90   : > { %v338_v40 = vpop.permute.xlu1 %337  ;;  %v2490_v41 = vpop.permute.xlu0 %2489  ;;  %v2925_v33 = vrot.slane %v290_v30, %v501_v29  ;;  %v2927_v34 = vrot.slane %v291_v31, %v501_v29  ;;  %v2929_v36 = vrot.slane %v290_v30, %v505_v32 }
  0x91   : > { %v2492_v42 = vunpack.i.h.bf16 %v2490_v41  ;;  %v2491_v43 = vunpack.i.l.bf16 %v2490_v41  ;;  %422 = vmatpush1.bf16.msra.mxu0 %v386_v38 }
  0x92   : > { %2350 = vmatpush3.bf16.msra.mxu1 %v388_v39 }
  0x93   : > { %2351 = vmatprep.subr.bf16.mxu1 %v2725_v0  ;;  %v344_v44 = vsel %vm343_vm5, %v2491_v43, %v2492_v42  ;;  %v346_v45 = vsel %vm343_vm5, %v2492_v42, %v338_v40  ;;  %v345_v46 = vsel %vm343_vm5, %v338_v40, %v2491_v43  ;;  %v2932_v40 = vrot.slane %v2925_v33, %v501_v29 }
  0x94   : > { %v2500_v47 = vpop.permute.xlu1 %2499  ;;  %v2495_v48 = vpop.permute.xlu0 %2494  ;;  %v384_v49 = vpack.c.bf16 %v344_v44, %v2790_v1  ;;  %v385_v50 = vpack.c.bf16 %v346_v45, %v2792_v2  ;;  %v383_v51 = vpack.c.bf16 %v345_v46, %v2794_v3  ;;  %v2935_v42 = vrot.slane %v2927_v34, %v501_v29 }
  0x95   : > { %v2502_v52 = vunpack.i.h.bf16 %v2500_v47  ;;  %v2501_v53 = vunpack.i.l.bf16 %v2500_v47  ;;  %v2497_v54 = vunpack.i.h.bf16 %v2495_v48  ;;  %v2496_v55 = vunpack.i.l.bf16 %v2495_v48 }
  0x96   : > { %423 = vmatprep.subr.bf16.mxu0 %v384_v49  ;;  %2352 = vmatpush3.bf16.msra.mxu1 %v385_v50  ;;  %v2938_v48 = vrot.slane %v2929_v36, %v501_v29 }
  0x97   : > { %424 = vmatpush1.bf16.msra.mxu0 %v383_v51  ;;  %v325_v56 = vsel %vm323_vm7, %v2496_v55, %v2497_v54  ;;  %v335_v57 = vsel %vm333_vm6, %v2501_v53, %v2502_v52  ;;  %2353 = vmatprep.subr.bf16.mxu1 %v2725_v0 }
  0x98   : > { %v332_v58 = vpop.permute.xlu1 %331  ;;  %v322_v59 = vpop.permute.xlu0 %321  ;;  %v381_v60 = vpack.c.bf16 %v335_v57, %v325_v56 }
  0x99   : > { %v334_v61 = vsel %vm333_vm6, %v2502_v52, %v332_v58  ;;  %v336_v62 = vsel %vm333_vm6, %v332_v58, %v2501_v53  ;;  %v324_v63 = vsel %vm323_vm7, %v2497_v54, %v322_v59  ;;  %v326_v4 = vsel %vm323_vm7, %v322_v59, %v2496_v55 }
  0x9a   : > { %v380_v5 = vpack.c.bf16 %v336_v62, %v326_v4  ;;  %v382_v7 = vpack.c.bf16 %v334_v61, %v324_v63  ;;  %425 = vmatprep.subr.bf16.mxu0 %v381_v60 }
  0x9c   : > { %v2510_v8 = vpop.permute.xlu1 %2509  ;;  %v2505_v11 = vpop.permute.xlu0 %2504  ;;  %426 = vmatpush1.bf16.msra.mxu0 %v380_v5  ;;  %2354 = vmatpush3.bf16.msra.mxu1 %v382_v7  ;;  %v2238_v7 = vld [vmem:[%s3767_s5 + $0x8] sm:$0xff] }
  0x9d   : > { %v2512_v12 = vunpack.i.h.bf16 %v2510_v8  ;;  %v2511_v13 = vunpack.i.l.bf16 %v2510_v8  ;;  %v2507_v14 = vunpack.i.h.bf16 %v2505_v11  ;;  %v2506_v15 = vunpack.i.l.bf16 %v2505_v11  ;;  %2355 = vmatprep.subr.bf16.mxu1 %v2725_v0 }
  0x9f   : > { %v305_v16 = vsel %vm303_vm9, %v2506_v15, %v2507_v14  ;;  %v315_v17 = vsel %vm313_vm8, %v2511_v13, %v2512_v12 }
  0xa0   : > { %v312_v18 = vpop.permute.xlu1 %311  ;;  %v300_v19 = vpop.permute.xlu0 %299  ;;  %v378_v20 = vpack.c.bf16 %v315_v17, %v305_v16 }
  0xa1   : > { %v314_v21 = vsel %vm313_vm8, %v2512_v12, %v312_v18  ;;  %v316_v22 = vsel %vm313_vm8, %v312_v18, %v2511_v13  ;;  %v304_v23 = vsel %vm303_vm9, %v2507_v14, %v300_v19  ;;  %v306_v24 = vsel %vm303_vm9, %v300_v19, %v2506_v15 }
  0xa2   : > { %v377_v25 = vpack.c.bf16 %v316_v22, %v306_v24  ;;  %v379_v26 = vpack.c.bf16 %v314_v21, %v304_v23  ;;  %427 = vmatprep.subr.bf16.mxu0 %v378_v20 }
  0xa4   : > { %428 = vmatpush1.bf16.msra.mxu0 %v377_v25  ;;  %2356 = vmatpush3.bf16.msra.mxu1 %v379_v26 }
  0xa5   : > { %2361 = vmatprep.subr.bf16.mxu1 %v2725_v0 }
  0xa7   : > { %2235 = vmatmul.mubr.msk.bf16.vlgmr.msra.gmra.mxu0 %vm399_vm10, %v392_v27  ;;  %2358 = vmatmul.mubr.msk.bf16.vlgmr.msra.gmra.mxu1 %vm399_vm10, %v392_v27 }
  0xa8   : > { %681 = vmatprep.mubr.bf16.mxu0 %v2732_v6  ;;  %2371 = vmatprep.mubr.msk.bf16.mxu1 %vm2733_vm0, %v2725_v0 }
  0xad   : > { %v397_v35 = vpop.permute.xlu0 %396  ;;  %v533_v49 = vpop.permute.xlu1 %532 }
 0x167   : > { %v447_v37 = vpop.f32.mrf.mxu0  ;;  %v488_v38 = vpop.f32.mrf.mxu1 }
 0x168   : > { %v448_v39 = vadd.f32 %v447_v37, %v397_v35  ;;  %v489_v41 = vadd.f32 %v488_v38, %v397_v35 }
 0x169   : > { %v449_v43 = vpop.f32.mrf.mxu0  ;;  %v2359_v44 = vpop.f32.mrf.mxu1 }
 0x16a   : > { %v494_v45 = vmax.f32 %v448_v39, 0.0  ;;  %v496_v46 = vmax.f32 %v489_v41, 0.0  ;;  %v450_v47 = vadd.f32 %v449_v43, %v397_v35 }
 0x16b   : > { %v451_v50 = vpop.f32.mrf.mxu0  ;;  %v491_v51 = vpop.f32.mrf.mxu1 }
 0x16c   : > { %v526_v52 = vmul.f32 %v2932_v40, %v494_v45  ;;  %v528_v53 = vmul.f32 %v2935_v42, %v496_v46  ;;  %v495_v54 = vmax.f32 %v450_v47, 0.0 }
 0x16d   : > { %v452_v55 = vpop.f32.mrf.mxu0  ;;  %v2360_v56 = vpop.f32.mrf.mxu1 }
 0x16e   : > { %v527_v57 = vmul.f32 %v2938_v48, %v495_v54  ;;  %v535_v58 = vadd.f32 %v533_v49, %v526_v52  ;;  %v537_v59 = vadd.f32 %v533_v49, %v528_v53 }
 0x170   : > { %v536_v60 = vadd.f32 %v533_v49, %v527_v57  ;;  %v2944_v61 = vmul.f32 %v535_v58, %v2932_v40  ;;  %v2947_v62 = vmul.f32 %v537_v59, %v2935_v42 }
 0x172   : > { %608 = vrot.lane.b32.xlu0 %v2947_v62, %s2727_s28  ;;  %586 = vrot.lane.b32.xlu1 %v2944_v61, %s2726_s27  ;;  %v2954_v63 = vmul.f32 %v536_v60, %v2938_v48 }
 0x174   : > { %v2515_v4 = vpack.i.bf16 %v2954_v63, %v2944_v61  ;;  %v2525_v5 = vpack.i.bf16 %v2947_v62, %v2954_v63 }
 0x176   : > { %595 = vrot.lane.b32.xlu0 %v2944_v61, %s2728_s29  ;;  %563 = vrot.lane.b32.xlu1 %v2947_v62, %s2731_s8 }
 0x17a   : > { %577 = vrot.lane.b32.xlu0 %v2944_v61, %s2729_s30  ;;  %2516 = vrot.lane.b32.xlu1 %v2515_v4, %s2727_s28 }
 0x17e   : > { %2526 = vrot.lane.b32.xlu0 %v2525_v5, %s2728_s29  ;;  %2521 = vrot.lane.b32.xlu1 %v2525_v5, %s2726_s27 }
 0x182   : > { %572 = vrot.lane.b32.xlu0 %v2947_v62, %s2730_s7  ;;  %2531 = vrot.lane.b32.xlu1 %v2525_v5, %s2729_s30 }
 0x186   : > { %2541 = vrot.lane.b32.xlu0 %v2515_v4, %s2730_s7  ;;  %2536 = vrot.lane.b32.xlu1 %v2515_v4, %s2731_s8 }
 0x18a   : > { %2551 = vrot.lane.b32.xlu0 %v2515_v4, %s2734_s10  ;;  %2546 = vrot.lane.b32.xlu1 %v2515_v4, %s2735_s11 }
 0x18e   : > { %554 = vrot.lane.b32.xlu0 %v2947_v62, %s2734_s10  ;;  %545 = vrot.lane.b32.xlu1 %v2947_v62, %s2735_s11 }
 0x192   : > { %634 = vperm.xlu1 %2514, %v2238_v7  }
 0x1e4   : > { %v609_v8 = vpop.permute.xlu0 %608  ;;  %v587_v11 = vpop.permute.xlu1 %586 }
 0x1e8   : > { %v596_v12 = vpop.permute.xlu0 %595  ;;  %v564_v13 = vpop.permute.xlu1 %563 }
 0x1ec   : > { %v578_v14 = vpop.permute.xlu0 %577  ;;  %v2517_v15 = vpop.permute.xlu1 %2516 }
 0x1ed   : > { %v2519_v16 = vunpack.i.h.bf16 %v2517_v15  ;;  %v2518_v17 = vunpack.i.l.bf16 %v2517_v15 }
 0x1ef   : > { %v610_v18 = vsel %vm373_vm1, %v2519_v16, %v609_v8  ;;  %v611_v19 = vsel %vm373_vm1, %v2518_v17, %v2519_v16  ;;  %v612_v20 = vsel %vm373_vm1, %v609_v8, %v2518_v17 }
 0x1f0   : > { %v626_v21 = vpack.c.bf16 %v610_v18, %v610_v18  ;;  %v2527_v22 = vpop.permute.xlu0 %2526  ;;  %v2522_v23 = vpop.permute.xlu1 %2521  ;;  %v625_v24 = vpack.c.bf16 %v611_v19, %v611_v19  ;;  %v627_v25 = vpack.c.bf16 %v612_v20, %v612_v20 }
 0x1f1   : > { %v2529_v26 = vunpack.i.h.bf16 %v2527_v22  ;;  %v2528_v27 = vunpack.i.l.bf16 %v2527_v22  ;;  %v2524_v29 = vunpack.i.h.bf16 %v2522_v23  ;;  %v2523_v30 = vunpack.i.l.bf16 %v2522_v23 }
 0x1f2   : > { %2239 = vmatprep.subr.msk.bf16.mxu0 %vm403_vm4, %v626_v21  ;;  %v641_v31 = vsel %vm403_vm4, %v625_v24, 0  ;;  %v647_v32 = vsel %vm403_vm4, %v627_v25, 0 }
 0x1f3   : > { %v603_v35 = vsel %vm363_vm2, %v2529_v26, %v596_v12  ;;  %v602_v37 = vsel %vm363_vm2, %v596_v12, %v2528_v27  ;;  %v594_v38 = vsel %vm353_vm3, %v2524_v29, %v587_v11  ;;  %v593_v39 = vsel %vm353_vm3, %v587_v11, %v2523_v30  ;;  %656 = vmatpush1.bf16.msra.mxu0 %v641_v31 }
 0x1f4   : > { %v624_v41 = vpack.c.bf16 %v603_v35, %v594_v38  ;;  %v622_v43 = vpack.c.bf16 %v602_v37, %v593_v39  ;;  %2362 = vmatpush3.bf16.msra.mxu1 %v647_v32  ;;  %v573_v44 = vpop.permute.xlu0 %572  ;;  %v2532_v45 = vpop.permute.xlu1 %2531  ;;  %v592_v46 = vsel %vm353_vm3, %v2523_v30, %v2524_v29  ;;  %v601_v47 = vsel %vm363_vm2, %v2528_v27, %v2529_v26  ;;  %v2237_v37 = vld [vmem:[%s3766_s4 + $0x4] sm:$0xf] }
 0x1f5   : > { %v2534_v49 = vunpack.i.h.bf16 %v2532_v45  ;;  %v2533_v50 = vunpack.i.l.bf16 %v2532_v45  ;;  %v623_v51 = vpack.c.bf16 %v601_v47, %v592_v46  ;;  %2363 = vmatprep.subr.bf16.mxu1 %v2725_v0 }
 0x1f7   : > { %v585_v52 = vsel %vm343_vm5, %v2534_v49, %v578_v14  ;;  %v584_v53 = vsel %vm343_vm5, %v578_v14, %v2533_v50  ;;  %657 = vmatprep.subr.bf16.mxu0 %v623_v51  ;;  %v583_v54 = vsel %vm343_vm5, %v2533_v50, %v2534_v49 }
 0x1f8   : > { %v621_v55 = vpack.c.bf16 %v585_v52, %v2947_v62  ;;  %v619_v56 = vpack.c.bf16 %v584_v53, %v2944_v61  ;;  %658 = vmatpush1.bf16.msra.mxu0 %v622_v43  ;;  %2364 = vmatpush3.bf16.msra.mxu1 %v624_v41  ;;  %v2542_v57 = vpop.permute.xlu0 %2541  ;;  %v2537_v58 = vpop.permute.xlu1 %2536  ;;  %v620_v59 = vpack.c.bf16 %v583_v54, %v2954_v63 }
 0x1f9   : > { %v2544_v60 = vunpack.i.h.bf16 %v2542_v57  ;;  %v2543_v4 = vunpack.i.l.bf16 %v2542_v57  ;;  %v2539_v5 = vunpack.i.h.bf16 %v2537_v58  ;;  %v2538_v7 = vunpack.i.l.bf16 %v2537_v58  ;;  %2365 = vmatprep.subr.bf16.mxu1 %v2725_v0 }
 0x1fa   : > { %659 = vmatprep.subr.bf16.mxu0 %v620_v59 }
 0x1fb   : > { %v574_v8 = vsel %vm333_vm6, %v2544_v60, %v573_v44  ;;  %v576_v62 = vsel %vm333_vm6, %v573_v44, %v2543_v4  ;;  %v565_v61 = vsel %vm323_vm7, %v2539_v5, %v564_v13  ;;  %v567_v11 = vsel %vm323_vm7, %v564_v13, %v2538_v7 }
 0x1fc   : > { %v618_v63 = vpack.c.bf16 %v574_v8, %v565_v61  ;;  %660 = vmatpush1.bf16.msra.mxu0 %v619_v56  ;;  %2366 = vmatpush3.bf16.msra.mxu1 %v621_v55  ;;  %v2552_v12 = vpop.permute.xlu0 %2551  ;;  %v2547_v14 = vpop.permute.xlu1 %2546  ;;  %v566_v15 = vsel %vm323_vm7, %v2538_v7, %v2539_v5  ;;  %v616_v20 = vpack.c.bf16 %v576_v62, %v567_v11 }
 0x1fd   : > { %v2554_v16 = vunpack.i.h.bf16 %v2552_v12  ;;  %v2553_v17 = vunpack.i.l.bf16 %v2552_v12  ;;  %v2549_v18 = vunpack.i.h.bf16 %v2547_v14  ;;  %v2548_v19 = vunpack.i.l.bf16 %v2547_v14  ;;  %2367 = vmatprep.subr.bf16.mxu1 %v2725_v0 }
 0x1fe   : > { %v575_v21 = vsel %vm333_vm6, %v2543_v4, %v2544_v60  ;;  %v2243_v4 = vld [vmem:[%s3767_s5 + $0x10] sm:$0xff] }
 0x1ff   : > { %v617_v22 = vpack.c.bf16 %v575_v21, %v566_v15  ;;  %v548_v13 = vsel %vm303_vm9, %v2548_v19, %v2549_v18  ;;  %v557_v23 = vsel %vm313_vm8, %v2553_v17, %v2554_v16 }
 0x200   : > { %2368 = vmatpush3.bf16.msra.mxu1 %v618_v63  ;;  %v555_v24 = vpop.permute.xlu0 %554  ;;  %v546_v25 = vpop.permute.xlu1 %545  ;;  %v614_v26 = vpack.c.bf16 %v557_v23, %v548_v13 }
 0x201   : > { %661 = vmatprep.subr.bf16.mxu0 %v617_v22  ;;  %v556_v27 = vsel %vm313_vm8, %v2554_v16, %v555_v24  ;;  %v558_v29 = vsel %vm313_vm8, %v555_v24, %v2553_v17  ;;  %v547_v30 = vsel %vm303_vm9, %v2549_v18, %v546_v25  ;;  %v549_v31 = vsel %vm303_vm9, %v546_v25, %v2548_v19 }
 0x202   : > { %662 = vmatpush1.bf16.msra.mxu0 %v616_v20  ;;  %v613_v32 = vpack.c.bf16 %v558_v29, %v549_v31  ;;  %v615_v35 = vpack.c.bf16 %v556_v27, %v547_v30  ;;  %2369 = vmatprep.subr.bf16.mxu1 %v2725_v0 }
 0x203   : > { %663 = vmatprep.subr.bf16.mxu0 %v614_v26 }
 0x204   : > { %2370 = vmatpush3.bf16.msra.mxu1 %v615_v35 }
 0x205   : > { %2375 = vmatprep.subr.bf16.mxu1 %v2725_v0 }
 0x206   : > { %664 = vmatpush1.bf16.msra.mxu0 %v613_v32 }
 0x207   : > { %2372 = vmatmul.mubr.msk.bf16.vlgmr.msra.gmra.mxu1 %vm399_vm10, %v2237_v37 }
 0x208   : > { %2385 = vmatprep.mubr.msk.bf16.mxu1 %vm2733_vm0, %v2725_v0 }
 0x209   : > { %2240 = vmatmul.mubr.msk.bf16.vlgmr.msra.gmra.mxu0 %vm399_vm10, %v2237_v37 }
 0x20a   : > { %876 = vmatprep.mubr.bf16.mxu0 %v2732_v6 }
 0x20d   : > { %v635_v38 = vpop.permute.xlu1 %634 }
 0x2c7   : > { %v724_v39 = vpop.f32.mrf.mxu1 }
 0x2c8   : > { %v725_v41 = vadd.f32 %v724_v39, %v635_v38 }
 0x2c9   : > { %v683_v43 = vpop.f32.mrf.mxu0  ;;  %v2373_v44 = vpop.f32.mrf.mxu1 }
 0x2ca   : > { %v684_v45 = vadd.f32 %v683_v43, %v635_v38  ;;  %v732_v46 = vmax.f32 %v725_v41, 0.0 }
 0x2cb   : > { %v685_v47 = vpop.f32.mrf.mxu0  ;;  %v727_v49 = vpop.f32.mrf.mxu1 }
 0x2cc   : > { %v730_v50 = vmax.f32 %v684_v45, 0.0  ;;  %v3051_v51 = vmul.f32 %v732_v46, %v2935_v42  ;;  %v686_v52 = vadd.f32 %v685_v47, %v635_v38 }
 0x2cd   : > { %v687_v53 = vpop.f32.mrf.mxu0  ;;  %v2374_v54 = vpop.f32.mrf.mxu1 }
 0x2ce   : > { %v731_v55 = vmax.f32 %v686_v52, 0.0  ;;  %758 = vrot.lane.b32.xlu0 %v3051_v51, %s2731_s8  ;;  %803 = vrot.lane.b32.xlu1 %v3051_v51, %s2727_s28  ;;  %v3058_v57 = vmul.f32 %v730_v50, %v2932_v40 }
 0x2cf   : > { %v688_v56 = vpop.f32.mrf.mxu0 }
 0x2d0   : > { %v3061_v58 = vmul.f32 %v731_v55, %v2938_v48 }
 0x2d2   : > { %790 = vrot.lane.b32.xlu1 %v3058_v57, %s2728_s29  ;;  %781 = vrot.lane.b32.xlu0 %v3058_v57, %s2726_s27  ;;  %v2555_v59 = vpack.i.bf16 %v3061_v58, %v3058_v57  ;;  %v2565_v60 = vpack.i.bf16 %v3051_v51, %v3061_v58 }
 0x2d6   : > { %772 = vrot.lane.b32.xlu1 %v3058_v57, %s2729_s30  ;;  %2556 = vrot.lane.b32.xlu0 %v2555_v59, %s2727_s28 }
 0x2da   : > { %2566 = vrot.lane.b32.xlu1 %v2565_v60, %s2728_s29  ;;  %2561 = vrot.lane.b32.xlu0 %v2565_v60, %s2726_s27 }
 0x2de   : > { %767 = vrot.lane.b32.xlu1 %v3051_v51, %s2730_s7  ;;  %2571 = vrot.lane.b32.xlu0 %v2565_v60, %s2729_s30 }
 0x2e2   : > { %2581 = vrot.lane.b32.xlu1 %v2555_v59, %s2730_s7  ;;  %2576 = vrot.lane.b32.xlu0 %v2555_v59, %s2731_s8 }
 0x2e6   : > { %2591 = vrot.lane.b32.xlu1 %v2555_v59, %s2734_s10  ;;  %2586 = vrot.lane.b32.xlu0 %v2555_v59, %s2735_s11 }
 0x2ea   : > { %749 = vrot.lane.b32.xlu1 %v3051_v51, %s2734_s10  ;;  %740 = vrot.lane.b32.xlu0 %v3051_v51, %s2735_s11 }
 0x2ee   : > { %829 = vperm.xlu0 %2513, %v2243_v4  }
 0x340   : > { %v759_v5 = vpop.permute.xlu0 %758  ;;  %v804_v7 = vpop.permute.xlu1 %803 }
 0x344   : > { %v791_v8 = vpop.permute.xlu1 %790  ;;  %v782_v62 = vpop.permute.xlu0 %781 }
 0x348   : > { %v773_v61 = vpop.permute.xlu1 %772  ;;  %v2557_v11 = vpop.permute.xlu0 %2556 }
 0x349   : > { %v2559_v63 = vunpack.i.h.bf16 %v2557_v11  ;;  %v2558_v12 = vunpack.i.l.bf16 %v2557_v11 }
 0x34b   : > { %v805_v14 = vsel %vm373_vm1, %v2559_v63, %v804_v7  ;;  %v806_v15 = vsel %vm373_vm1, %v2558_v12, %v2559_v63  ;;  %v807_v16 = vsel %vm373_vm1, %v804_v7, %v2558_v12 }
 0x34c   : > { %v821_v17 = vpack.c.bf16 %v805_v14, %v805_v14  ;;  %v2567_v18 = vpop.permute.xlu1 %2566  ;;  %v2562_v19 = vpop.permute.xlu0 %2561  ;;  %v820_v20 = vpack.c.bf16 %v806_v15, %v806_v15  ;;  %v822_v21 = vpack.c.bf16 %v807_v16, %v807_v16 }
 0x34d   : > { %v2569_v22 = vunpack.i.h.bf16 %v2567_v18  ;;  %v2568_v13 = vunpack.i.l.bf16 %v2567_v18  ;;  %v2564_v23 = vunpack.i.h.bf16 %v2562_v19  ;;  %v2563_v24 = vunpack.i.l.bf16 %v2562_v19 }
 0x34e   : > { %2244 = vmatprep.subr.msk.bf16.mxu0 %vm403_vm4, %v821_v17  ;;  %v836_v25 = vsel %vm403_vm4, %v820_v20, 0  ;;  %v842_v26 = vsel %vm403_vm4, %v822_v21, 0 }
 0x34f   : > { %v798_v27 = vsel %vm363_vm2, %v2569_v22, %v791_v8  ;;  %v797_v29 = vsel %vm363_vm2, %v791_v8, %v2568_v13  ;;  %v789_v30 = vsel %vm353_vm3, %v2564_v23, %v782_v62  ;;  %v788_v31 = vsel %vm353_vm3, %v782_v62, %v2563_v24  ;;  %851 = vmatpush1.bf16.msra.mxu0 %v836_v25 }
 0x350   : > { %v819_v32 = vpack.c.bf16 %v798_v27, %v789_v30  ;;  %v817_v35 = vpack.c.bf16 %v797_v29, %v788_v31  ;;  %2376 = vmatpush3.bf16.msra.mxu1 %v842_v26  ;;  %v768_v37 = vpop.permute.xlu1 %767  ;;  %v2572_v38 = vpop.permute.xlu0 %2571  ;;  %v787_v39 = vsel %vm353_vm3, %v2563_v24, %v2564_v23  ;;  %v796_v41 = vsel %vm363_vm2, %v2568_v13, %v2569_v22  ;;  %v2242_v29 = vld [vmem:[%s3766_s4 + $0x8] sm:$0xf] }
 0x351   : > { %v2574_v43 = vunpack.i.h.bf16 %v2572_v38  ;;  %v2573_v44 = vunpack.i.l.bf16 %v2572_v38  ;;  %v818_v45 = vpack.c.bf16 %v796_v41, %v787_v39  ;;  %2377 = vmatprep.subr.bf16.mxu1 %v2725_v0  ;;  %v2247_v30 = vsel %vm930_vm11, 1.0, %v2725_v0 }
 0x352   : > { %v2736_v31 = vmov 1966171168   ;;  %v935_v39 = vmul.f32 %v2247_v30, %v2792_v2 }
 0x353   : > { %v780_v46 = vsel %vm343_vm5, %v2574_v43, %v773_v61  ;;  %v779_v47 = vsel %vm343_vm5, %v773_v61, %v2573_v44  ;;  %852 = vmatprep.subr.bf16.mxu0 %v818_v45  ;;  %v778_v49 = vsel %vm343_vm5, %v2573_v44, %v2574_v43 }
 0x354   : > { %v816_v50 = vpack.c.bf16 %v780_v46, %v3051_v51  ;;  %v814_v52 = vpack.c.bf16 %v779_v47, %v3058_v57  ;;  %853 = vmatpush1.bf16.msra.mxu0 %v817_v35  ;;  %2378 = vmatpush3.bf16.msra.mxu1 %v819_v32  ;;  %v2582_v53 = vpop.permute.xlu1 %2581  ;;  %v2577_v54 = vpop.permute.xlu0 %2576  ;;  %v815_v55 = vpack.c.bf16 %v778_v49, %v3061_v58  ;;  %v1526_v32 = vunpack.c.l.s4 %v2736_v31 }
 0x355   : > { %v2584_v56 = vunpack.i.h.bf16 %v2582_v53  ;;  %v2583_v59 = vunpack.i.l.bf16 %v2582_v53  ;;  %v2579_v60 = vunpack.i.h.bf16 %v2577_v54  ;;  %v2578_v4 = vunpack.i.l.bf16 %v2577_v54  ;;  %2379 = vmatprep.subr.bf16.mxu1 %v2725_v0 }
 0x356   : > { %854 = vmatprep.subr.bf16.mxu0 %v815_v55  ;;  %v1527_v46 = vunpack.c.0.s8 %v1526_v32  ;;  %v933_v47 = vmul.f32 %v2247_v30, %v2794_v3  ;;  %v934_v55 = vmul.f32 %v2247_v30, %v2790_v1 }
 0x357   : > { %v769_v7 = vsel %vm333_vm6, %v2584_v56, %v768_v37  ;;  %v771_v51 = vsel %vm333_vm6, %v768_v37, %v2583_v59  ;;  %v760_v57 = vsel %vm323_vm7, %v2579_v60, %v759_v5  ;;  %v762_v8 = vsel %vm323_vm7, %v759_v5, %v2578_v4 }
 0x358   : > { %v813_v58 = vpack.c.bf16 %v769_v7, %v760_v57  ;;  %855 = vmatpush1.bf16.msra.mxu0 %v814_v52  ;;  %2380 = vmatpush3.bf16.msra.mxu1 %v816_v50  ;;  %v2592_v62 = vpop.permute.xlu1 %2591  ;;  %v2587_v61 = vpop.permute.xlu0 %2586  ;;  %v761_v11 = vsel %vm323_vm7, %v2578_v4, %v2579_v60  ;;  %v811_v16 = vpack.c.bf16 %v771_v51, %v762_v8 }
 0x359   : > { %v2594_v63 = vunpack.i.h.bf16 %v2592_v62  ;;  %v2593_v12 = vunpack.i.l.bf16 %v2592_v62  ;;  %v2589_v14 = vunpack.i.h.bf16 %v2587_v61  ;;  %v2588_v15 = vunpack.i.l.bf16 %v2587_v61  ;;  %2381 = vmatprep.subr.bf16.mxu1 %v2725_v0 }
 0x35a   : > { %v770_v17 = vsel %vm333_vm6, %v2583_v59, %v2584_v56  ;;  %v3179_v2 = vsub.s32 %v1527_v46, %v2915_v28 }
 0x35b   : > { %v812_v18 = vpack.c.bf16 %v770_v17, %v761_v11  ;;  %v743_v5 = vsel %vm303_vm9, %v2588_v15, %v2589_v14  ;;  %v752_v19 = vsel %vm313_vm8, %v2593_v12, %v2594_v63 }
 0x35c   : > { %2382 = vmatpush3.bf16.msra.mxu1 %v813_v58  ;;  %v750_v20 = vpop.permute.xlu1 %749  ;;  %v741_v21 = vpop.permute.xlu0 %740  ;;  %v809_v22 = vpack.c.bf16 %v752_v19, %v743_v5 }
 0x35d   : > { %856 = vmatprep.subr.bf16.mxu0 %v812_v18  ;;  %v751_v13 = vsel %vm313_vm8, %v2594_v63, %v750_v20  ;;  %v753_v23 = vsel %vm313_vm8, %v750_v20, %v2593_v12  ;;  %v742_v24 = vsel %vm303_vm9, %v2589_v14, %v741_v21  ;;  %v744_v25 = vsel %vm303_vm9, %v741_v21, %v2588_v15 }
 0x35e   : > { %857 = vmatpush1.bf16.msra.mxu0 %v811_v16  ;;  %v808_v26 = vpack.c.bf16 %v753_v23, %v744_v25  ;;  %v810_v27 = vpack.c.bf16 %v751_v13, %v742_v24  ;;  %2383 = vmatprep.subr.bf16.mxu1 %v2725_v0 }
 0x35f   : > { %858 = vmatprep.subr.bf16.mxu0 %v809_v22 }
 0x360   : > { %2384 = vmatpush3.bf16.msra.mxu1 %v810_v27 }
 0x361   : > { %2389 = vmatprep.subr.bf16.mxu1 %v2725_v0 }
 0x362   : > { %859 = vmatpush1.bf16.msra.mxu0 %v808_v26 }
 0x363   : > { %2386 = vmatmul.mubr.msk.bf16.vlgmr.msra.gmra.mxu1 %vm399_vm10, %v2242_v29 }
 0x364   : > { %2399 = vmatprep.mubr.msk.bf16.mxu1 %vm2733_vm0, %v2725_v0 }
 0x365   : > { %2245 = vmatmul.mubr.msk.bf16.vlgmr.msra.gmra.mxu0 %vm399_vm10, %v2242_v29 }
 0x366   : > { %1079 = vmatprep.mubr.bf16.mxu0 %v2732_v6 }
 0x369   : > { %v830_v35 = vpop.permute.xlu0 %829 }
 0x423   : > { %v919_v37 = vpop.f32.mrf.mxu1 }
 0x424   : > { %v920_v38 = vadd.f32 %v919_v37, %v830_v35 }
 0x425   : > { %v878_v41 = vpop.f32.mrf.mxu0  ;;  %v2387_v43 = vpop.f32.mrf.mxu1 }
 0x426   : > { %v879_v44 = vadd.f32 %v878_v41, %v830_v35  ;;  %v927_v45 = vmul.f32 %v920_v38, %v2935_v42 }
 0x427   : > { %v880_v49 = vpop.f32.mrf.mxu0  ;;  %v922_v50 = vpop.f32.mrf.mxu1 }
 0x428   : > { %v925_v52 = vmul.f32 %v879_v44, %v2932_v40  ;;  %v3175_v53 = vadd.f32 %v935_v39, %v927_v45  ;;  %v881_v54 = vadd.f32 %v880_v49, %v830_v35  ;;  %v1538_v51 = vrot.slane %v927_v45, %v3179_v2 }
 0x429   : > { %v882_v56 = vpop.f32.mrf.mxu0  ;;  %v2388_v59 = vpop.f32.mrf.mxu1 }
 0x42a   : > { %v926_v60 = vmul.f32 %v881_v54, %v2938_v48  ;;  %961 = vrot.lane.b32.xlu1 %v3175_v53, %s2731_s8  ;;  %1006 = vrot.lane.b32.xlu0 %v3175_v53, %s2727_s28  ;;  %v3186_v4 = vadd.f32 %v933_v47, %v925_v52 }
 0x42b   : > { %v883_v3 = vpop.f32.mrf.mxu0 }
 0x42c   : > { %v3188_v7 = vadd.f32 %v934_v55, %v926_v60  ;;  %v1524_v1 = vcombine.low %v925_v52, %v926_v60 }
 0x42e   : > { %v1531_v57 = vrot.slane %v1524_v1, %v3179_v2  ;;  %993 = vrot.lane.b32.xlu0 %v3186_v4, %s2728_s29  ;;  %984 = vrot.lane.b32.xlu1 %v3186_v4, %s2726_s27  ;;  %v2595_v58 = vpack.i.bf16 %v3188_v7, %v3186_v4  ;;  %v2605_v11 = vpack.i.bf16 %v3175_v53, %v3188_v7 }
 0x430   : > { %v1539_v8 = vcombine.low %v1531_v57, %v1538_v51 }
 0x432   : > { %v1546_v61 = vrot.slane %v1539_v8, %v3179_v2  ;;  %975 = vrot.lane.b32.xlu0 %v3186_v4, %s2729_s30  ;;  %2596 = vrot.lane.b32.xlu1 %v2595_v58, %s2727_s28 }
 0x434   : > { %1552 = vst.msk [vmem:[%s3161_s19] ss:$8 sm:$0x7] %vm3199_vm12, %v1546_v61 }
 0x436   : > { %2606 = vrot.lane.b32.xlu0 %v2605_v11, %s2728_s29  ;;  %2601 = vrot.lane.b32.xlu1 %v2605_v11, %s2726_s27 }
 0x43a   : > { %970 = vrot.lane.b32.xlu0 %v3175_v53, %s2730_s7  ;;  %2611 = vrot.lane.b32.xlu1 %v2605_v11, %s2729_s30 }
 0x43e   : > { %2621 = vrot.lane.b32.xlu0 %v2595_v58, %s2730_s7  ;;  %2616 = vrot.lane.b32.xlu1 %v2595_v58, %s2731_s8 }
 0x442   : > { %2631 = vrot.lane.b32.xlu0 %v2595_v58, %s2734_s10  ;;  %2626 = vrot.lane.b32.xlu1 %v2595_v58, %s2735_s11 }
 0x446   : > { %952 = vrot.lane.b32.xlu0 %v3175_v53, %s2734_s10  ;;  %943 = vrot.lane.b32.xlu1 %v3175_v53, %s2735_s11 }
 0x44a   : > { %1032 = vperm.xlu1 %2514, %v2249_v9  }
 0x49c   : > { %v962_v63 = vpop.permute.xlu1 %961  ;;  %v1007_v12 = vpop.permute.xlu0 %1006 }
 0x4a0   : > { %v994_v14 = vpop.permute.xlu0 %993  ;;  %v985_v15 = vpop.permute.xlu1 %984 }
 0x4a4   : > { %v976_v16 = vpop.permute.xlu0 %975  ;;  %v2597_v17 = vpop.permute.xlu1 %2596 }
 0x4a5   : > { %v2599_v18 = vunpack.i.h.bf16 %v2597_v17  ;;  %v2598_v5 = vunpack.i.l.bf16 %v2597_v17 }
 0x4a7   : > { %v1008_v19 = vsel %vm373_vm1, %v2599_v18, %v1007_v12  ;;  %v1009_v20 = vsel %vm373_vm1, %v2598_v5, %v2599_v18  ;;  %v1010_v21 = vsel %vm373_vm1, %v1007_v12, %v2598_v5 }
 0x4a8   : > { %v1024_v22 = vpack.c.bf16 %v1008_v19, %v1008_v19  ;;  %v2607_v13 = vpop.permute.xlu0 %2606  ;;  %v2602_v23 = vpop.permute.xlu1 %2601  ;;  %v1023_v24 = vpack.c.bf16 %v1009_v20, %v1009_v20  ;;  %v1025_v25 = vpack.c.bf16 %v1010_v21, %v1010_v21 }
 0x4a9   : > { %v2609_v26 = vunpack.i.h.bf16 %v2607_v13  ;;  %v2608_v27 = vunpack.i.l.bf16 %v2607_v13  ;;  %v2604_v29 = vunpack.i.h.bf16 %v2602_v23  ;;  %v2603_v30 = vunpack.i.l.bf16 %v2602_v23 }
 0x4aa   : > { %2250 = vmatprep.subr.msk.bf16.mxu0 %vm403_vm4, %v1024_v22  ;;  %v1039_v31 = vsel %vm403_vm4, %v1023_v24, 0  ;;  %v1045_v32 = vsel %vm403_vm4, %v1025_v25, 0 }
 0x4ab   : > { %v1001_v35 = vsel %vm363_vm2, %v2609_v26, %v994_v14  ;;  %v1000_v37 = vsel %vm363_vm2, %v994_v14, %v2608_v27  ;;  %v992_v38 = vsel %vm353_vm3, %v2604_v29, %v985_v15  ;;  %v991_v39 = vsel %vm353_vm3, %v985_v15, %v2603_v30  ;;  %1054 = vmatpush1.bf16.msra.mxu0 %v1039_v31 }
 0x4ac   : > { %v1022_v41 = vpack.c.bf16 %v1001_v35, %v992_v38  ;;  %v1020_v43 = vpack.c.bf16 %v1000_v37, %v991_v39  ;;  %2390 = vmatpush3.bf16.msra.mxu1 %v1045_v32  ;;  %v971_v44 = vpop.permute.xlu0 %970  ;;  %v2612_v45 = vpop.permute.xlu1 %2611  ;;  %v990_v46 = vsel %vm353_vm3, %v2603_v30, %v2604_v29  ;;  %v999_v47 = vsel %vm363_vm2, %v2608_v27, %v2609_v26  ;;  %v2248_v32 = vld [vmem:[%s3766_s4 + $0xc] sm:$0xf] }
 0x4ad   : > { %v2614_v49 = vunpack.i.h.bf16 %v2612_v45  ;;  %v2613_v50 = vunpack.i.l.bf16 %v2612_v45  ;;  %v1021_v52 = vpack.c.bf16 %v999_v47, %v990_v46  ;;  %2391 = vmatprep.subr.bf16.mxu1 %v2725_v0 }
 0x4af   : > { %v983_v54 = vsel %vm343_vm5, %v2614_v49, %v976_v16  ;;  %v982_v55 = vsel %vm343_vm5, %v976_v16, %v2613_v50  ;;  %1055 = vmatprep.subr.bf16.mxu0 %v1021_v52  ;;  %v981_v56 = vsel %vm343_vm5, %v2613_v50, %v2614_v49 }
 0x4b0   : > { %v1019_v59 = vpack.c.bf16 %v983_v54, %v3175_v53  ;;  %v1017_v60 = vpack.c.bf16 %v982_v55, %v3186_v4  ;;  %1056 = vmatpush1.bf16.msra.mxu0 %v1020_v43  ;;  %2392 = vmatpush3.bf16.msra.mxu1 %v1022_v41  ;;  %v2622_v3 = vpop.permute.xlu0 %2621  ;;  %v2617_v1 = vpop.permute.xlu1 %2616  ;;  %v1018_v51 = vpack.c.bf16 %v981_v56, %v3188_v7 }
 0x4b1   : > { %v2624_v57 = vunpack.i.h.bf16 %v2622_v3  ;;  %v2623_v8 = vunpack.i.l.bf16 %v2622_v3  ;;  %v2619_v58 = vunpack.i.h.bf16 %v2617_v1  ;;  %v2618_v61 = vunpack.i.l.bf16 %v2617_v1  ;;  %2393 = vmatprep.subr.bf16.mxu1 %v2725_v0 }
 0x4b2   : > { %1057 = vmatprep.subr.bf16.mxu0 %v1018_v51  ;;  %v2254_v51 = vld [vmem:[%s3767_s5 + $0x20] sm:$0xff] }
 0x4b3   : > { %v972_v11 = vsel %vm333_vm6, %v2624_v57, %v971_v44  ;;  %v974_v53 = vsel %vm333_vm6, %v971_v44, %v2623_v8  ;;  %v963_v4 = vsel %vm323_vm7, %v2619_v58, %v962_v63  ;;  %v965_v9 = vsel %vm323_vm7, %v962_v63, %v2618_v61 }
 0x4b4   : > { %v1016_v7 = vpack.c.bf16 %v972_v11, %v963_v4  ;;  %1058 = vmatpush1.bf16.msra.mxu0 %v1017_v60  ;;  %2394 = vmatpush3.bf16.msra.mxu1 %v1019_v59  ;;  %v2632_v12 = vpop.permute.xlu0 %2631  ;;  %v2627_v14 = vpop.permute.xlu1 %2626  ;;  %v964_v15 = vsel %vm323_vm7, %v2618_v61, %v2619_v58  ;;  %v1014_v19 = vpack.c.bf16 %v974_v53, %v965_v9 }
 0x4b5   : > { %v2634_v16 = vunpack.i.h.bf16 %v2632_v12  ;;  %v2633_v17 = vunpack.i.l.bf16 %v2632_v12  ;;  %v2629_v18 = vunpack.i.h.bf16 %v2627_v14  ;;  %v2628_v5 = vunpack.i.l.bf16 %v2627_v14  ;;  %2395 = vmatprep.subr.bf16.mxu1 %v2725_v0 }
 0x4b6   : > { %v973_v20 = vsel %vm333_vm6, %v2623_v8, %v2624_v57 }
 0x4b7   : > { %v1015_v21 = vpack.c.bf16 %v973_v20, %v964_v15  ;;  %v946_v63 = vsel %vm303_vm9, %v2628_v5, %v2629_v18  ;;  %v955_v22 = vsel %vm313_vm8, %v2633_v17, %v2634_v16 }
 0x4b8   : > { %2396 = vmatpush3.bf16.msra.mxu1 %v1016_v7  ;;  %v953_v13 = vpop.permute.xlu0 %952  ;;  %v944_v23 = vpop.permute.xlu1 %943  ;;  %v1012_v24 = vpack.c.bf16 %v955_v22, %v946_v63 }
 0x4b9   : > { %1059 = vmatprep.subr.bf16.mxu0 %v1015_v21  ;;  %v954_v25 = vsel %vm313_vm8, %v2634_v16, %v953_v13  ;;  %v956_v26 = vsel %vm313_vm8, %v953_v13, %v2633_v17  ;;  %v945_v27 = vsel %vm303_vm9, %v2629_v18, %v944_v23  ;;  %v947_v29 = vsel %vm303_vm9, %v944_v23, %v2628_v5 }
 0x4ba   : > { %1060 = vmatpush1.bf16.msra.mxu0 %v1014_v19  ;;  %v1011_v30 = vpack.c.bf16 %v956_v26, %v947_v29  ;;  %v1013_v31 = vpack.c.bf16 %v954_v25, %v945_v27  ;;  %2397 = vmatprep.subr.bf16.mxu1 %v2725_v0 }
 0x4bb   : > { %1061 = vmatprep.subr.bf16.mxu0 %v1012_v24 }
 0x4bc   : > { %2398 = vmatpush3.bf16.msra.mxu1 %v1013_v31 }
 0x4bd   : > { %2403 = vmatprep.subr.bf16.mxu1 %v2725_v0 }
 0x4be   : > { %1062 = vmatpush1.bf16.msra.mxu0 %v1011_v30 }
 0x4bf   : > { %2400 = vmatmul.mubr.msk.bf16.vlgmr.msra.gmra.mxu1 %vm399_vm10, %v2248_v32 }
 0x4c0   : > { %2413 = vmatprep.mubr.msk.bf16.mxu1 %vm2733_vm0, %v2725_v0 }
 0x4c1   : > { %2251 = vmatmul.mubr.msk.bf16.vlgmr.msra.gmra.mxu0 %vm399_vm10, %v2248_v32 }
 0x4c2   : > { %1274 = vmatprep.mubr.bf16.mxu0 %v2732_v6 }
 0x4c5   : > { %v1033_v35 = vpop.permute.xlu1 %1032 }
 0x57f   : > { %v1122_v37 = vpop.f32.mrf.mxu1 }
 0x580   : > { %v1123_v38 = vadd.f32 %v1122_v37, %v1033_v35 }
 0x581   : > { %v1081_v39 = vpop.f32.mrf.mxu0  ;;  %v2401_v41 = vpop.f32.mrf.mxu1 }
 0x582   : > { %v1082_v43 = vadd.f32 %v1081_v39, %v1033_v35  ;;  %v1130_v44 = vmax.f32 %v1123_v38, 0.0 }
 0x583   : > { %v1083_v45 = vpop.f32.mrf.mxu0  ;;  %v1125_v46 = vpop.f32.mrf.mxu1 }
 0x584   : > { %v1128_v47 = vmax.f32 %v1082_v43, 0.0  ;;  %v3296_v49 = vmul.f32 %v1130_v44, %v2935_v42  ;;  %v1084_v50 = vadd.f32 %v1083_v45, %v1033_v35 }
 0x585   : > { %v1085_v52 = vpop.f32.mrf.mxu0  ;;  %v2402_v54 = vpop.f32.mrf.mxu1 }
 0x586   : > { %v1129_v55 = vmax.f32 %v1084_v50, 0.0  ;;  %1156 = vrot.lane.b32.xlu0 %v3296_v49, %s2731_s8  ;;  %1201 = vrot.lane.b32.xlu1 %v3296_v49, %s2727_s28  ;;  %v3303_v59 = vmul.f32 %v1128_v47, %v2932_v40 }
 0x587   : > { %v1086_v56 = vpop.f32.mrf.mxu0 }
 0x588   : > { %v3306_v60 = vmul.f32 %v1129_v55, %v2938_v48 }
 0x58a   : > { %1188 = vrot.lane.b32.xlu1 %v3303_v59, %s2728_s29  ;;  %1179 = vrot.lane.b32.xlu0 %v3303_v59, %s2726_s27  ;;  %v2635_v3 = vpack.i.bf16 %v3306_v60, %v3303_v59  ;;  %v2645_v1 = vpack.i.bf16 %v3296_v49, %v3306_v60 }
 0x58e   : > { %1170 = vrot.lane.b32.xlu1 %v3303_v59, %s2729_s30  ;;  %2636 = vrot.lane.b32.xlu0 %v2635_v3, %s2727_s28 }
 0x592   : > { %2646 = vrot.lane.b32.xlu1 %v2645_v1, %s2728_s29  ;;  %2641 = vrot.lane.b32.xlu0 %v2645_v1, %s2726_s27 }
 0x596   : > { %1165 = vrot.lane.b32.xlu1 %v3296_v49, %s2730_s7  ;;  %2651 = vrot.lane.b32.xlu0 %v2645_v1, %s2729_s30 }
 0x59a   : > { %2661 = vrot.lane.b32.xlu1 %v2635_v3, %s2730_s7  ;;  %2656 = vrot.lane.b32.xlu0 %v2635_v3, %s2731_s8 }
 0x59e   : > { %2671 = vrot.lane.b32.xlu1 %v2635_v3, %s2734_s10  ;;  %2666 = vrot.lane.b32.xlu0 %v2635_v3, %s2735_s11 }
 0x5a2   : > { %1147 = vrot.lane.b32.xlu1 %v3296_v49, %s2734_s10  ;;  %1138 = vrot.lane.b32.xlu0 %v3296_v49, %s2735_s11 }
 0x5a6   : > { %1227 = vperm.xlu0 %2513, %v2254_v51  }
 0x5f8   : > { %v1157_v57 = vpop.permute.xlu0 %1156  ;;  %v1202_v8 = vpop.permute.xlu1 %1201 }
 0x5fc   : > { %v1189_v58 = vpop.permute.xlu1 %1188  ;;  %v1180_v61 = vpop.permute.xlu0 %1179 }
 0x600   : > { %v1171_v11 = vpop.permute.xlu1 %1170  ;;  %v2637_v53 = vpop.permute.xlu0 %2636 }
 0x601   : > { %v2639_v4 = vunpack.i.h.bf16 %v2637_v53  ;;  %v2638_v9 = vunpack.i.l.bf16 %v2637_v53 }
 0x603   : > { %v1203_v7 = vsel %vm373_vm1, %v2639_v4, %v1202_v8  ;;  %v1204_v12 = vsel %vm373_vm1, %v2638_v9, %v2639_v4  ;;  %v1205_v14 = vsel %vm373_vm1, %v1202_v8, %v2638_v9 }
 0x604   : > { %v1219_v15 = vpack.c.bf16 %v1203_v7, %v1203_v7  ;;  %v2647_v16 = vpop.permute.xlu1 %2646  ;;  %v2642_v17 = vpop.permute.xlu0 %2641  ;;  %v1218_v18 = vpack.c.bf16 %v1204_v12, %v1204_v12  ;;  %v1220_v5 = vpack.c.bf16 %v1205_v14, %v1205_v14 }
 0x605   : > { %v2649_v19 = vunpack.i.h.bf16 %v2647_v16  ;;  %v2648_v20 = vunpack.i.l.bf16 %v2647_v16  ;;  %v2644_v21 = vunpack.i.h.bf16 %v2642_v17  ;;  %v2643_v63 = vunpack.i.l.bf16 %v2642_v17 }
 0x606   : > { %2255 = vmatprep.subr.msk.bf16.mxu0 %vm403_vm4, %v1219_v15  ;;  %v1234_v22 = vsel %vm403_vm4, %v1218_v18, 0  ;;  %v1240_v13 = vsel %vm403_vm4, %v1220_v5, 0 }
 0x607   : > { %v1196_v23 = vsel %vm363_vm2, %v2649_v19, %v1189_v58  ;;  %v1195_v24 = vsel %vm363_vm2, %v1189_v58, %v2648_v20  ;;  %v1187_v25 = vsel %vm353_vm3, %v2644_v21, %v1180_v61  ;;  %v1186_v26 = vsel %vm353_vm3, %v1180_v61, %v2643_v63  ;;  %1249 = vmatpush1.bf16.msra.mxu0 %v1234_v22 }
 0x608   : > { %v1217_v27 = vpack.c.bf16 %v1196_v23, %v1187_v25  ;;  %v1215_v29 = vpack.c.bf16 %v1195_v24, %v1186_v26  ;;  %2404 = vmatpush3.bf16.msra.mxu1 %v1240_v13  ;;  %v1166_v30 = vpop.permute.xlu1 %1165  ;;  %v2652_v31 = vpop.permute.xlu0 %2651  ;;  %v1185_v32 = vsel %vm353_vm3, %v2643_v63, %v2644_v21  ;;  %v1194_v35 = vsel %vm363_vm2, %v2648_v20, %v2649_v19  ;;  %v2253_v13 = vld [vmem:[%s3766_s4 + $0x10] sm:$0xf] }
 0x609   : > { %v2654_v37 = vunpack.i.h.bf16 %v2652_v31  ;;  %v2653_v38 = vunpack.i.l.bf16 %v2652_v31  ;;  %v1216_v39 = vpack.c.bf16 %v1194_v35, %v1185_v32  ;;  %2405 = vmatprep.subr.bf16.mxu1 %v2725_v0 }
 0x60b   : > { %v1178_v41 = vsel %vm343_vm5, %v2654_v37, %v1171_v11  ;;  %v1177_v43 = vsel %vm343_vm5, %v1171_v11, %v2653_v38  ;;  %1250 = vmatprep.subr.bf16.mxu0 %v1216_v39  ;;  %v1176_v44 = vsel %vm343_vm5, %v2653_v38, %v2654_v37 }
 0x60c   : > { %v1214_v45 = vpack.c.bf16 %v1178_v41, %v3296_v49  ;;  %v1212_v46 = vpack.c.bf16 %v1177_v43, %v3303_v59  ;;  %1251 = vmatpush1.bf16.msra.mxu0 %v1215_v29  ;;  %2406 = vmatpush3.bf16.msra.mxu1 %v1217_v27  ;;  %v2662_v47 = vpop.permute.xlu1 %2661  ;;  %v2657_v50 = vpop.permute.xlu0 %2656  ;;  %v1213_v52 = vpack.c.bf16 %v1176_v44, %v3306_v60 }
 0x60d   : > { %v2664_v54 = vunpack.i.h.bf16 %v2662_v47  ;;  %v2663_v55 = vunpack.i.l.bf16 %v2662_v47  ;;  %v2659_v56 = vunpack.i.h.bf16 %v2657_v50  ;;  %v2658_v3 = vunpack.i.l.bf16 %v2657_v50  ;;  %2407 = vmatprep.subr.bf16.mxu1 %v2725_v0 }
 0x60e   : > { %1252 = vmatprep.subr.bf16.mxu0 %v1213_v52  ;;  %v2259_v52 = vld [vmem:[%s3767_s5 + $0x28] sm:$0xff] }
 0x60f   : > { %v1167_v1 = vsel %vm333_vm6, %v2664_v54, %v1166_v30  ;;  %v1169_v49 = vsel %vm333_vm6, %v1166_v30, %v2663_v55  ;;  %v1158_v59 = vsel %vm323_vm7, %v2659_v56, %v1157_v57  ;;  %v1160_v51 = vsel %vm323_vm7, %v1157_v57, %v2658_v3 }
 0x610   : > { %v1211_v60 = vpack.c.bf16 %v1167_v1, %v1158_v59  ;;  %1253 = vmatpush1.bf16.msra.mxu0 %v1212_v46  ;;  %2408 = vmatpush3.bf16.msra.mxu1 %v1214_v45  ;;  %v2672_v8 = vpop.permute.xlu1 %2671  ;;  %v2667_v58 = vpop.permute.xlu0 %2666  ;;  %v1159_v61 = vsel %vm323_vm7, %v2658_v3, %v2659_v56  ;;  %v1209_v7 = vpack.c.bf16 %v1169_v49, %v1160_v51 }
 0x611   : > { %v2674_v11 = vunpack.i.h.bf16 %v2672_v8  ;;  %v2673_v53 = vunpack.i.l.bf16 %v2672_v8  ;;  %v2669_v4 = vunpack.i.h.bf16 %v2667_v58  ;;  %v2668_v9 = vunpack.i.l.bf16 %v2667_v58  ;;  %2409 = vmatprep.subr.bf16.mxu1 %v2725_v0 }
 0x612   : > { %v1168_v12 = vsel %vm333_vm6, %v2663_v55, %v2664_v54 }
 0x613   : > { %v1210_v14 = vpack.c.bf16 %v1168_v12, %v1159_v61  ;;  %v1141_v57 = vsel %vm303_vm9, %v2668_v9, %v2669_v4  ;;  %v1150_v15 = vsel %vm313_vm8, %v2673_v53, %v2674_v11 }
 0x614   : > { %2410 = vmatpush3.bf16.msra.mxu1 %v1211_v60  ;;  %v1148_v16 = vpop.permute.xlu1 %1147  ;;  %v1139_v17 = vpop.permute.xlu0 %1138  ;;  %v1207_v18 = vpack.c.bf16 %v1150_v15, %v1141_v57 }
 0x615   : > { %1254 = vmatprep.subr.bf16.mxu0 %v1210_v14  ;;  %v1149_v5 = vsel %vm313_vm8, %v2674_v11, %v1148_v16  ;;  %v1151_v19 = vsel %vm313_vm8, %v1148_v16, %v2673_v53  ;;  %v1140_v20 = vsel %vm303_vm9, %v2669_v4, %v1139_v17  ;;  %v1142_v21 = vsel %vm303_vm9, %v1139_v17, %v2668_v9 }
 0x616   : > { %1255 = vmatpush1.bf16.msra.mxu0 %v1209_v7  ;;  %v1206_v63 = vpack.c.bf16 %v1151_v19, %v1142_v21  ;;  %v1208_v22 = vpack.c.bf16 %v1149_v5, %v1140_v20  ;;  %2411 = vmatprep.subr.bf16.mxu1 %v2725_v0 }
 0x617   : > { %1256 = vmatprep.subr.bf16.mxu0 %v1207_v18 }
 0x618   : > { %2412 = vmatpush3.bf16.msra.mxu1 %v1208_v22 }
 0x619   : > { %2417 = vmatprep.subr.bf16.mxu1 %v2725_v0 }
 0x61a   : > { %1257 = vmatpush1.bf16.msra.mxu0 %v1206_v63 }
 0x61b   : > { %2414 = vmatmul.mubr.msk.bf16.vlgmr.msra.gmra.mxu1 %vm399_vm10, %v2253_v13 }
 0x61c   : > { %2427 = vmatprep.mubr.msk.bf16.mxu1 %vm2733_vm0, %v2725_v0 }
 0x61d   : > { %2256 = vmatmul.mubr.msk.bf16.vlgmr.msra.gmra.mxu0 %vm399_vm10, %v2253_v13 }
 0x61e   : > { %1469 = vmatprep.mubr.bf16.mxu0 %v2732_v6 }
 0x621   : > { %v1228_v23 = vpop.permute.xlu0 %1227 }
 0x6db   : > { %v1317_v24 = vpop.f32.mrf.mxu1 }
 0x6dc   : > { %v1318_v25 = vadd.f32 %v1317_v24, %v1228_v23 }
 0x6dd   : > { %v1276_v26 = vpop.f32.mrf.mxu0  ;;  %v2415_v27 = vpop.f32.mrf.mxu1 }
 0x6de   : > { %v1277_v29 = vadd.f32 %v1276_v26, %v1228_v23  ;;  %v1325_v30 = vmax.f32 %v1318_v25, 0.0 }
 0x6df   : > { %v1278_v31 = vpop.f32.mrf.mxu0  ;;  %v1320_v32 = vpop.f32.mrf.mxu1 }
 0x6e0   : > { %v1323_v35 = vmax.f32 %v1277_v29, 0.0  ;;  %v3403_v37 = vmul.f32 %v1325_v30, %v2935_v42  ;;  %v1279_v38 = vadd.f32 %v1278_v31, %v1228_v23 }
 0x6e1   : > { %v1280_v39 = vpop.f32.mrf.mxu0  ;;  %v2416_v41 = vpop.f32.mrf.mxu1 }
 0x6e2   : > { %v1324_v43 = vmax.f32 %v1279_v38, 0.0  ;;  %1351 = vrot.lane.b32.xlu1 %v3403_v37, %s2731_s8  ;;  %1396 = vrot.lane.b32.xlu0 %v3403_v37, %s2727_s28  ;;  %v3410_v45 = vmul.f32 %v1323_v35, %v2932_v40 }
 0x6e3   : > { %v1281_v44 = vpop.f32.mrf.mxu0 }
 0x6e4   : > { %v3413_v46 = vmul.f32 %v1324_v43, %v2938_v48 }
 0x6e6   : > { %1383 = vrot.lane.b32.xlu0 %v3410_v45, %s2728_s29  ;;  %1374 = vrot.lane.b32.xlu1 %v3410_v45, %s2726_s27  ;;  %v2675_v47 = vpack.i.bf16 %v3413_v46, %v3410_v45  ;;  %v2685_v50 = vpack.i.bf16 %v3403_v37, %v3413_v46 }
 0x6ea   : > { %1365 = vrot.lane.b32.xlu0 %v3410_v45, %s2729_s30  ;;  %2676 = vrot.lane.b32.xlu1 %v2675_v47, %s2727_s28 }
 0x6ee   : > { %2686 = vrot.lane.b32.xlu0 %v2685_v50, %s2728_s29  ;;  %2681 = vrot.lane.b32.xlu1 %v2685_v50, %s2726_s27 }
 0x6f2   : > { %1360 = vrot.lane.b32.xlu0 %v3403_v37, %s2730_s7  ;;  %2691 = vrot.lane.b32.xlu1 %v2685_v50, %s2729_s30 }
 0x6f6   : > { %2701 = vrot.lane.b32.xlu0 %v2675_v47, %s2730_s7  ;;  %2696 = vrot.lane.b32.xlu1 %v2675_v47, %s2731_s8 }
 0x6fa   : > { %2711 = vrot.lane.b32.xlu0 %v2675_v47, %s2734_s10  ;;  %2706 = vrot.lane.b32.xlu1 %v2675_v47, %s2735_s11 }
 0x6fe   : > { %1342 = vrot.lane.b32.xlu0 %v3403_v37, %s2734_s10  ;;  %1333 = vrot.lane.b32.xlu1 %v3403_v37, %s2735_s11  ;;  %s279_s10 = scalar_lea.vmem %s3763_s1, %s2784_s23 }
 0x6ff   : > { %v1571_v10 = vld [vmem:[%s279_s10] sm:$0xff] }
 0x702   : > { %1422 = vperm.xlu1 %2514, %v2259_v52  }
 0x754   : > { %v1352_v54 = vpop.permute.xlu1 %1351  ;;  %v1397_v55 = vpop.permute.xlu0 %1396 }
 0x758   : > { %v1384_v56 = vpop.permute.xlu0 %1383  ;;  %v1375_v3 = vpop.permute.xlu1 %1374 }
 0x75c   : > { %v1366_v1 = vpop.permute.xlu0 %1365  ;;  %v2677_v49 = vpop.permute.xlu1 %2676 }
 0x75d   : > { %v2679_v59 = vunpack.i.h.bf16 %v2677_v49  ;;  %v2678_v51 = vunpack.i.l.bf16 %v2677_v49 }
 0x75f   : > { %v1398_v60 = vsel %vm373_vm1, %v2679_v59, %v1397_v55  ;;  %v1399_v8 = vsel %vm373_vm1, %v2678_v51, %v2679_v59  ;;  %v1400_v58 = vsel %vm373_vm1, %v1397_v55, %v2678_v51 }
 0x760   : > { %v1414_v61 = vpack.c.bf16 %v1398_v60, %v1398_v60  ;;  %v2687_v11 = vpop.permute.xlu0 %2686  ;;  %v2682_v53 = vpop.permute.xlu1 %2681  ;;  %v1413_v4 = vpack.c.bf16 %v1399_v8, %v1399_v8  ;;  %v1415_v9 = vpack.c.bf16 %v1400_v58, %v1400_v58 }
 0x761   : > { %v2689_v7 = vunpack.i.h.bf16 %v2687_v11  ;;  %v2688_v12 = vunpack.i.l.bf16 %v2687_v11  ;;  %v2684_v14 = vunpack.i.h.bf16 %v2682_v53  ;;  %v2683_v57 = vunpack.i.l.bf16 %v2682_v53 }
 0x762   : > { %2260 = vmatprep.subr.msk.bf16.mxu0 %vm403_vm4, %v1414_v61  ;;  %v1429_v15 = vsel %vm403_vm4, %v1413_v4, 0  ;;  %v1435_v16 = vsel %vm403_vm4, %v1415_v9, 0 }
 0x763   : > { %v1391_v17 = vsel %vm363_vm2, %v2689_v7, %v1384_v56  ;;  %v1390_v18 = vsel %vm363_vm2, %v1384_v56, %v2688_v12  ;;  %v1382_v5 = vsel %vm353_vm3, %v2684_v14, %v1375_v3  ;;  %v1381_v19 = vsel %vm353_vm3, %v1375_v3, %v2683_v57  ;;  %1444 = vmatpush1.bf16.msra.mxu0 %v1429_v15 }
 0x764   : > { %v1412_v20 = vpack.c.bf16 %v1391_v17, %v1382_v5  ;;  %v1410_v21 = vpack.c.bf16 %v1390_v18, %v1381_v19  ;;  %2418 = vmatpush3.bf16.msra.mxu1 %v1435_v16  ;;  %v1361_v63 = vpop.permute.xlu0 %1360  ;;  %v2692_v22 = vpop.permute.xlu1 %2691  ;;  %v1380_v13 = vsel %vm353_vm3, %v2683_v57, %v2684_v14  ;;  %v1389_v23 = vsel %vm363_vm2, %v2688_v12, %v2689_v7  ;;  %v2258_v16 = vld [vmem:[%s3766_s4 + $0x14] sm:$0xf]  ;;  %v1572_v17 = vld [vmem:[%s279_s10 + $0x8] sm:$0xff] }
 0x765   : > { %v2694_v24 = vunpack.i.h.bf16 %v2692_v22  ;;  %v2693_v25 = vunpack.i.l.bf16 %v2692_v22  ;;  %v1411_v26 = vpack.c.bf16 %v1389_v23, %v1380_v13  ;;  %2419 = vmatprep.subr.bf16.mxu1 %v2725_v0  ;;  %v1574_v18 = vadd.f32 1.0, %v1571_v10 }
 0x766   : > { %v1575_v5 = vadd.f32 1.0, %v1572_v17  ;;  %v3518_v22 = vsub.s32 1, %v2915_v28  ;;  %v3546_v17 = vadd.s32 16, %v2915_v28  ;;  %vm1967_vm3 = vcmask 1040384  }
 0x767   : > { %v1373_v27 = vsel %vm343_vm5, %v2694_v24, %v1366_v1  ;;  %v1372_v29 = vsel %vm343_vm5, %v1366_v1, %v2693_v25  ;;  %1445 = vmatprep.subr.bf16.mxu0 %v1411_v26  ;;  %v1371_v30 = vsel %vm343_vm5, %v2693_v25, %v2694_v24  ;;  %v1577_v19 = vmul.f32 0.5, %v1574_v18  ;;  %v2715_v25 = vld [vmem:[%s3765_s3 + $0x8] sm:$0x7] }
 0x768   : > { %v1409_v31 = vpack.c.bf16 %v1373_v27, %v3403_v37  ;;  %v1407_v32 = vpack.c.bf16 %v1372_v29, %v3410_v45  ;;  %1446 = vmatpush1.bf16.msra.mxu0 %v1410_v21  ;;  %2420 = vmatpush3.bf16.msra.mxu1 %v1412_v20  ;;  %v2702_v35 = vpop.permute.xlu0 %2701  ;;  %v2697_v38 = vpop.permute.xlu1 %2696  ;;  %v1408_v39 = vpack.c.bf16 %v1371_v30, %v3413_v46  ;;  %v1578_v20 = vmul.f32 0.5, %v1575_v5  ;;  %v1573_v29 = vld [vmem:[%s279_s10 + $0x10] sm:$0x3] }
 0x769   : > { %v2704_v41 = vunpack.i.h.bf16 %v2702_v35  ;;  %v2703_v43 = vunpack.i.l.bf16 %v2702_v35  ;;  %v2699_v44 = vunpack.i.h.bf16 %v2697_v38  ;;  %v2698_v47 = vunpack.i.l.bf16 %v2697_v38  ;;  %2421 = vmatprep.subr.bf16.mxu1 %v2725_v0  ;;  %v2716_v38 = vld [vmem:[%s3765_s3] sm:$0x77] }
 0x76a   : > { %1447 = vmatprep.subr.bf16.mxu0 %v1408_v39  ;;  %v3510_v21 = vpack.c.bf16 %v1578_v20, %v1577_v19  ;;  %v1611_v27 = vrot.slane %v2715_v25, %v3518_v22  ;;  %v3549_v18 = vadd.s32 8, %v2915_v28 }
 0x76b   : > { %v1362_v50 = vsel %vm333_vm6, %v2704_v41, %v1361_v63  ;;  %v1364_v37 = vsel %vm333_vm6, %v1361_v63, %v2703_v43  ;;  %v1353_v45 = vsel %vm323_vm7, %v2699_v44, %v1352_v54  ;;  %v1355_v52 = vsel %vm323_vm7, %v1352_v54, %v2698_v47 }
 0x76c   : > { %v1406_v46 = vpack.c.bf16 %v1362_v50, %v1353_v45  ;;  %1448 = vmatpush1.bf16.msra.mxu0 %v1407_v32  ;;  %2422 = vmatpush3.bf16.msra.mxu1 %v1409_v31  ;;  %v2712_v55 = vpop.permute.xlu0 %2711  ;;  %v2707_v56 = vpop.permute.xlu1 %2706  ;;  %v1354_v3 = vsel %vm323_vm7, %v2698_v47, %v2699_v44  ;;  %v1404_v60 = vpack.c.bf16 %v1364_v37, %v1355_v52  ;;  %v3515_v63 = vsub.s32 0, %v2915_v28 }
 0x76d   : > { %v2714_v1 = vunpack.i.h.bf16 %v2712_v55  ;;  %v2713_v49 = vunpack.i.l.bf16 %v2712_v55  ;;  %v2709_v59 = vunpack.i.h.bf16 %v2707_v56  ;;  %v2708_v51 = vunpack.i.l.bf16 %v2707_v56  ;;  %2423 = vmatprep.subr.bf16.mxu1 %v2725_v0 }
 0x76e   : > { %v1363_v8 = vsel %vm333_vm6, %v2703_v43, %v2704_v41  ;;  %v1593_v26 = vrot.slane %v2715_v25, %v3515_v63  ;;  %v1588_v31 = vsub.s32 4, %v2915_v28  ;;  %v1585_v39 = vrot.slane %v2716_v38, %v3515_v63 }
 0x76f   : > { %v1405_v58 = vpack.c.bf16 %v1363_v8, %v1354_v3  ;;  %v1336_v54 = vsel %vm303_vm9, %v2708_v51, %v2709_v59  ;;  %v1345_v61 = vsel %vm313_vm8, %v2713_v49, %v2714_v1  ;;  %v1603_v41 = vrot.slane %v2716_v38, %v3518_v22 }
 0x770   : > { %2424 = vmatpush3.bf16.msra.mxu1 %v1406_v46  ;;  %v1343_v11 = vpop.permute.xlu0 %1342  ;;  %v1334_v53 = vpop.permute.xlu1 %1333  ;;  %v1402_v4 = vpack.c.bf16 %v1345_v61, %v1336_v54  ;;  %v1576_v50 = vadd.f32 1.0, %v1573_v29  ;;  %v1589_v56 = vrot.slane %v2716_v38, %v1588_v31  ;;  %v1606_v3 = vsub.s32 5, %v2915_v28 }
 0x771   : > { %1449 = vmatprep.subr.bf16.mxu0 %v1405_v58  ;;  %v1344_v9 = vsel %vm313_vm8, %v2714_v1, %v1343_v11  ;;  %v1346_v7 = vsel %vm313_vm8, %v1343_v11, %v2713_v49  ;;  %v1335_v12 = vsel %vm303_vm9, %v2709_v59, %v1334_v53  ;;  %v1337_v14 = vsel %vm303_vm9, %v1334_v53, %v2708_v51 }
 0x772   : > { %1450 = vmatpush1.bf16.msra.mxu0 %v1404_v60  ;;  %v1401_v57 = vpack.c.bf16 %v1346_v7, %v1337_v14  ;;  %v1403_v15 = vpack.c.bf16 %v1344_v9, %v1335_v12  ;;  %2425 = vmatprep.subr.bf16.mxu1 %v2725_v0  ;;  %v1579_v54 = vmul.f32 0.5, %v1576_v50  ;;  %v1607_v12 = vrot.slane %v2716_v38, %v1606_v3 }
 0x773   : > { %1451 = vmatprep.subr.bf16.mxu0 %v1402_v4 }
 0x774   : > { %2426 = vmatpush3.bf16.msra.mxu1 %v1403_v15 }
 0x776   : > { %1452 = vmatpush1.bf16.msra.mxu0 %v1401_v57 }
 0x777   : > { %2428 = vmatmul.mubr.msk.bf16.vlgmr.msra.gmra.mxu1 %vm399_vm10, %v2258_v16 }
 0x778   : > { %2435 = vmatprep.mubr.msk.bf16.mxu1 %vm1960_vm13, %v3510_v21 }
 0x779   : > { %2261 = vmatmul.mubr.msk.bf16.vlgmr.msra.gmra.mxu0 %vm399_vm10, %v2258_v16 }
 0x77a   : > { %2009 = vmatprep.mubr.bf16.mxu0 %v2732_v6 }
 0x77d   : > { %v1423_v13 = vpop.permute.xlu1 %1422 }
 0x837   : > { %v1512_v23 = vpop.f32.mrf.mxu1 }
 0x838   : > { %v1513_v24 = vadd.f32 %v1512_v23, %v1423_v13 }
 0x839   : > { %v1471_v30 = vpop.f32.mrf.mxu0  ;;  %v2429_v32 = vpop.f32.mrf.mxu1 }
 0x83a   : > { %v1472_v35 = vadd.f32 %v1471_v30, %v1423_v13  ;;  %v1520_v43 = vmul.f32 %v1513_v24, %v2935_v42 }
 0x83b   : > { %v1473_v44 = vpop.f32.mrf.mxu0  ;;  %v1515_v47 = vpop.f32.mrf.mxu1 }
 0x83c   : > { %v1518_v37 = vmul.f32 %v1472_v35, %v2932_v40  ;;  %v1559_v45 = vrot.slane %v1520_v43, 7  ;;  %v1599_v52 = vadd.f32 %v1593_v26, %v1520_v43  ;;  %v1617_v46 = vadd.f32 %v1611_v27, %v1520_v43 }
 0x83d   : > { %v1474_v55 = vadd.f32 %v1473_v44, %v1423_v13  ;;  %v1475_v1 = vpop.f32.mrf.mxu0  ;;  %v2430_v49 = vpop.f32.mrf.mxu1  ;;  %v3555_v13 = vpack.c.bf16 %v1579_v54, %v1579_v54 }
 0x83e   : > { %v1557_v59 = vrot.slane %v1518_v37, 7  ;;  %v1597_v51 = vadd.f32 %v1585_v39, %v1518_v37  ;;  %v3534_v60 = vadd.f32 %v1603_v41, %v1518_v37  ;;  %1565 = vst [vmem:[%s3161_s19 + $0x10] sm:$0x6] %v1559_v45  ;;  %v1620_v42 = vfloor.f32 %v1599_v52 }
 0x83f   : > { %v1623_v8 = vfloor.f32 %v1617_v46  ;;  %v1519_v58 = vmul.f32 %v1474_v55, %v2938_v48  ;;  %v1476_v40 = vpop.f32.mrf.mxu0 }
 0x840   : > { %1563 = vst [vmem:[%s3161_s19] sm:$0x6] %v1557_v59  ;;  %v1618_v61 = vfloor.f32 %v1597_v51  ;;  %v1621_v11 = vfloor.f32 %v3534_v60  ;;  %v1626_v53 = vsub.f32 %v1599_v52, %v1620_v42  ;;  %v2445_v4 = vtrunc.f32 %v1620_v42 }
 0x841   : > { %v2451_v9 = vtrunc.f32 %v1623_v8  ;;  %v1558_v7 = vrot.slane %v1519_v58, 7  ;;  %v1598_v16 = vadd.f32 %v1589_v56, %v1519_v58  ;;  %v3551_v19 = vsub.f32 %v1617_v46, %v1623_v8 }
 0x842   : > { %v3540_v14 = vsub.f32 %v1597_v51, %v1618_v61  ;;  %v2441_v57 = vtrunc.f32 %v1618_v61  ;;  %v2447_v15 = vtrunc.f32 %v1621_v11  ;;  %v2446_v48 = vcvt.f32.s32 %v2445_v4 }
 0x843   : > { %v1731_v10 = vsub.f32 1.0, %v1626_v53  ;;  %1564 = vst [vmem:[%s3161_s19 + $0x8] sm:$0x6] %v1558_v7  ;;  %v3553_v20 = vcvt.f32.s32 %v2451_v9  ;;  %v1803_v25 = vrot.slane %v1626_v53, %v3515_v63  ;;  %v1619_v30 = vfloor.f32 %v1598_v16 }
 0x844   : > { %v2442_v5 = vcvt.f32.s32 %v2441_v57  ;;  %v3557_v23 = vcvt.f32.s32 %v2447_v15  ;;  %vm1637_vm14 = vcmp.gt.s32.totalorder %v2446_v48, 0  ;;  %v1647_v24 = vadd.s32 1, %v2446_v48 }
 0x845   : > { %v1729_v26 = vsub.f32 1.0, %v3540_v14  ;;  %v3563_v27 = vrot.slane %v3540_v14, %v3515_v63  ;;  %v1638_v29 = vsel %vm1637_vm14, %v2446_v48, 0  ;;  %v1743_v31 = vrot.slane %v1731_v10, %v3515_v63 }
 0x846   : > { %vm1633_vm15 = vcmp.gt.s32.totalorder %v2442_v5, 0  ;;  %vm1643_vm0 = vcmp.lt.s32.totalorder %v1638_v29, 17  ;;  %vm1652_vm1 = vcmp.gt.s32.totalorder %v1647_v24, 0  ;;  %v1625_v38 = vsub.f32 %v1598_v16, %v1619_v30 }
 0x847   : > { %v1644_v32 = vsel %vm1643_vm0, %v1638_v29, 17  ;;  %v1653_v35 = vsel %vm1652_vm1, %v1647_v24, 0  ;;  %v2443_v39 = vtrunc.f32 %v1619_v30  ;;  %v1645_v41 = vadd.s32 1, %v2442_v5 }
 0x848   : > { %v3566_v43 = vadd.f32 %v1607_v12, %v1519_v58  ;;  %vm1658_vm2 = vcmp.lt.s32.totalorder %v1653_v35, 17  ;;  %v1701_v44 = vrot.slane %v1644_v32, %v3515_v63  ;;  %v1634_v47 = vsel %vm1633_vm15, %v2442_v5, 0 }
 0x849   : > { %v2444_v50 = vcvt.f32.s32 %v2443_v39  ;;  %v1730_v37 = vsub.f32 1.0, %v1625_v38  ;;  %v1659_v45 = vsel %vm1658_vm2, %v1653_v35, 17  ;;  %v3570_v52 = vrot.slane %v1625_v38, %v3515_v63 }
 0x84a   : > { %vm1710_vm4 = vcmp.eq.s32.totalorder %v3546_v17, %v1701_v44  ;;  %v1764_v46 = vrot.slane %v1659_v45, %v3515_v63  ;;  %vm1704_vm5 = vcmp.eq.s32.totalorder %v2915_v28, %v1701_v44  ;;  %vm1707_vm8 = vcmp.eq.s32.totalorder %v3549_v18, %v1701_v44 }
 0x84b   : > { %vm1635_vm6 = vcmp.gt.s32.totalorder %v2444_v50, 0  ;;  %v1646_v55 = vadd.s32 1, %v2444_v50  ;;  %v1739_v56 = vrot.slane %v1730_v37, %v3515_v63  ;;  %v2271_v3 = vsel %vm1710_vm4, 1.0, %v2725_v0 }
 0x84c   : > { %v1636_v1 = vsel %vm1635_vm6, %v2444_v50, 0  ;;  %v1752_v49 = vmul.f32 %v2271_v3, %v1743_v31  ;;  %vm1773_vm7 = vcmp.eq.s32.totalorder %v3546_v17, %v1764_v46  ;;  %v2265_v51 = vsel %vm1704_vm5, 1.0, %v2725_v0 }
 0x84d   : > { %vm1641_vm9 = vcmp.lt.s32.totalorder %v1636_v1, 17  ;;  %vm1650_vm10 = vcmp.gt.s32.totalorder %v1646_v55, 0  ;;  %v2280_v59 = vsel %vm1773_vm7, 1.0, %v2725_v0  ;;  %v2268_v40 = vsel %vm1707_vm8, 1.0, %v2725_v0 }
 0x84e   : > { %v1642_v42 = vsel %vm1641_vm9, %v1636_v1, 17  ;;  %v1651_v8 = vsel %vm1650_vm10, %v1646_v55, 0  ;;  %v1812_v58 = vmul.f32 %v2280_v59, %v1803_v25  ;;  %v1746_v61 = vmul.f32 %v2265_v51, %v1743_v31 }
 0x84f   : > { %vm1656_vm11 = vcmp.lt.s32.totalorder %v1651_v8, 17  ;;  %v1697_v54 = vrot.slane %v1642_v42, %v3515_v63  ;;  %v1749_v53 = vmul.f32 %v2268_v40, %v1743_v31  ;;  %vm1767_vm14 = vcmp.eq.s32.totalorder %v2915_v28, %v1764_v46 }
 0x850   : > { %v1821_v4 = vadd.f32 %v1812_v58, %v1752_v49  ;;  %v1657_v9 = vsel %vm1656_vm11, %v1651_v8, 17  ;;  %vm1770_vm15 = vcmp.eq.s32.totalorder %v3549_v18, %v1764_v46  ;;  %v2274_v12 = vsel %vm1767_vm14, 1.0, %v2725_v0 }
 0x851   : > { %vm1709_vm0 = vcmp.eq.s32.totalorder %v3546_v17, %v1697_v54  ;;  %v1760_v7 = vrot.slane %v1657_v9, %v3515_v63  ;;  %v2277_v57 = vsel %vm1770_vm15, 1.0, %v2725_v0  ;;  %v1806_v48 = vmul.f32 %v2274_v12, %v1803_v25 }
 0x852   : > { %v1959_v15 = vpack.c.bf16 %v1821_v4, %v1821_v4  ;;  %v2270_v16 = vsel %vm1709_vm0, 1.0, %v2725_v0  ;;  %v1809_v10 = vmul.f32 %v2277_v57, %v1803_v25  ;;  %vm1639_vm2 = vcmp.lt.s32.totalorder %v1634_v47, 17 }
 0x853   : > { %v1751_v5 = vmul.f32 %v2270_v16, %v1739_v56  ;;  %vm1772_vm1 = vcmp.eq.s32.totalorder %v3546_v17, %v1760_v7  ;;  %vm1648_vm4 = vcmp.gt.s32.totalorder %v1645_v41, 0  ;;  %v1815_v30 = vadd.f32 %v1806_v48, %v1746_v61 }
 0x854   : > { %2439 = vmatprep.subr.msk.bf16.mxu1 %vm1967_vm3, %v1959_v15  ;;  %v1975_v24 = vsel %vm1967_vm3, %v1959_v15, 0  ;;  %v2279_v29 = vsel %vm1772_vm1, 1.0, %v2725_v0  ;;  %v1818_v31 = vadd.f32 %v1809_v10, %v1749_v53  ;;  %v1640_v35 = vsel %vm1639_vm2, %v1634_v47, 17 }
 0x855   : > { %2432 = vmatpush3.bf16.msra.mxu1 %v1975_v24  ;;  %v1811_v32 = vmul.f32 %v2279_v29, %v3570_v52  ;;  %v1649_v38 = vsel %vm1648_vm4, %v1645_v41, 0  ;;  %v1735_v25 = vrot.slane %v1729_v26, %v3515_v63  ;;  %v1693_v44 = vrot.slane %v1640_v35, %v3515_v63 }
 0x856   : > { %v1956_v39 = vpack.c.bf16 %v1818_v31, %v1815_v30  ;;  %vm1654_vm5 = vcmp.lt.s32.totalorder %v1649_v38, 17  ;;  %vm1703_vm6 = vcmp.eq.s32.totalorder %v2915_v28, %v1697_v54  ;;  %vm1706_vm7 = vcmp.eq.s32.totalorder %v3549_v18, %v1697_v54 }
 0x857   : > { %v1820_v50 = vadd.f32 %v1811_v32, %v1751_v5  ;;  %v1655_v37 = vsel %vm1654_vm5, %v1649_v38, 17  ;;  %v2264_v45 = vsel %vm1703_vm6, 1.0, %v2725_v0  ;;  %vm1708_vm8 = vcmp.eq.s32.totalorder %v3546_v17, %v1693_v44 }
 0x858   : > { %2433 = vmatprep.subr.bf16.mxu1 %v1956_v39  ;;  %v1756_v41 = vrot.slane %v1655_v37, %v3515_v63  ;;  %v2267_v14 = vsel %vm1706_vm7, 1.0, %v2725_v0  ;;  %v1745_v26 = vmul.f32 %v2264_v45, %v1739_v56  ;;  %v2269_v46 = vsel %vm1708_vm8, 1.0, %v2725_v0 }
 0x859   : > { %v1958_v47 = vpack.c.bf16 %v1820_v50, %v1820_v50  ;;  %v1748_v55 = vmul.f32 %v2267_v14, %v1739_v56  ;;  %vm1766_vm9 = vcmp.eq.s32.totalorder %v2915_v28, %v1760_v7  ;;  %2434 = vmatpush3.bf16.msra.mxu1 %v1956_v39  ;;  %v1750_v3 = vmul.f32 %v2269_v46, %v1735_v25 }
 0x85a   : > { %vm1771_vm10 = vcmp.eq.s32.totalorder %v3546_v17, %v1756_v41  ;;  %vm1769_vm11 = vcmp.eq.s32.totalorder %v3549_v18, %v1760_v7  ;;  %v2273_v1 = vsel %vm1766_vm9, 1.0, %v2725_v0  ;;  %vm1702_vm14 = vcmp.eq.s32.totalorder %v2915_v28, %v1693_v44 }
 0x85b   : > { %2299 = vmatprep.subr.msk.bf16.mxu0 %vm1967_vm3, %v1958_v47  ;;  %v2278_v63 = vsel %vm1771_vm10, 1.0, %v2725_v0  ;;  %v2276_v49 = vsel %vm1769_vm11, 1.0, %v2725_v0  ;;  %v1805_v59 = vmul.f32 %v2273_v1, %v3570_v52  ;;  %vm1705_vm15 = vcmp.eq.s32.totalorder %v3549_v18, %v1693_v44 }
 0x85c   : > { %v1810_v56 = vmul.f32 %v2278_v63, %v3563_v27  ;;  %v1808_v51 = vmul.f32 %v2276_v49, %v3570_v52  ;;  %v2263_v42 = vsel %vm1702_vm14, 1.0, %v2725_v0  ;;  %2436 = vmatmul.mubr.msk.bf16.vlgmr.msra.gmra.mxu1 %vm1960_vm13, %v3555_v13  ;;  %v1622_v8 = vfloor.f32 %v3566_v43 }
 0x85d   : > { %v1814_v58 = vadd.f32 %v1805_v59, %v1745_v26  ;;  %v2266_v40 = vsel %vm1705_vm15, 1.0, %v2725_v0  ;;  %vm1765_vm0 = vcmp.eq.s32.totalorder %v2915_v28, %v1756_v41  ;;  %v1744_v53 = vmul.f32 %v2263_v42, %v1735_v25 }
 0x85e   : > { %v1819_v54 = vadd.f32 %v1810_v56, %v1750_v3  ;;  %v1817_v61 = vadd.f32 %v1808_v51, %v1748_v55  ;;  %vm1768_vm1 = vcmp.eq.s32.totalorder %v3549_v18, %v1756_v41  ;;  %v2272_v52 = vsel %vm1765_vm0, 1.0, %v2725_v0 }
 0x85f   : > { %v2275_v4 = vsel %vm1768_vm1, 1.0, %v2725_v0  ;;  %vm1667_vm2 = vcmp.gt.s32.totalorder %v3553_v20, 0  ;;  %v1677_v9 = vadd.s32 1, %v3553_v20  ;;  %v1747_v12 = vmul.f32 %v2266_v40, %v1735_v25 }
 0x860   : > { %v1957_v7 = vpack.c.bf16 %v1819_v54, %v1819_v54  ;;  %v1804_v57 = vmul.f32 %v2272_v52, %v3563_v27  ;;  %v1807_v15 = vmul.f32 %v2275_v4, %v3563_v27  ;;  %v1955_v16 = vpack.c.bf16 %v1817_v61, %v1814_v58 }
 0x861   : > { %v1668_v48 = vsel %vm1667_vm2, %v3553_v20, 0  ;;  %vm1682_vm4 = vcmp.gt.s32.totalorder %v1677_v9, 0  ;;  %v1863_v10 = vsub.f32 1.0, %v3551_v19  ;;  %v2449_v30 = vtrunc.f32 %v1622_v8 }
 0x862   : > { %v1969_v5 = vsel %vm1967_vm3, %v1957_v7, 0  ;;  %v1813_v24 = vadd.f32 %v1804_v57, %v1744_v53  ;;  %v1816_v29 = vadd.f32 %v1807_v15, %v1747_v12  ;;  %vm1673_vm5 = vcmp.lt.s32.totalorder %v1668_v48, 17 }
 0x863   : > { %1990 = vmatpush1.bf16.msra.mxu0 %v1969_v5  ;;  %v1674_v31 = vsel %vm1673_vm5, %v1668_v48, 17  ;;  %v1683_v32 = vsel %vm1682_vm4, %v1677_v9, 0  ;;  %vm1663_vm6 = vcmp.gt.s32.totalorder %v3557_v23, 0  ;;  %v1675_v25 = vadd.s32 1, %v3557_v23 }
 0x864   : > { %1991 = vmatprep.subr.bf16.mxu0 %v1955_v16  ;;  %vm1688_vm7 = vcmp.lt.s32.totalorder %v1683_v32, 17  ;;  %v3638_v20 = vrot.slane %v1674_v31, %v3518_v22  ;;  %v1664_v27 = vsel %vm1663_vm6, %v3557_v23, 0  ;;  %v1954_v35 = vpack.c.bf16 %v1816_v29, %v1813_v24 }
 0x865   : > { %v1689_v38 = vsel %vm1688_vm7, %v1683_v32, 17  ;;  %vm1669_vm3 = vcmp.lt.s32.totalorder %v1664_v27, 17  ;;  %v1627_v39 = vsub.f32 %v3534_v60, %v1621_v11  ;;  %v3648_v44 = vrot.slane %v1863_v10, %v3518_v22 }
 0x866   : > { %vm1842_vm8 = vcmp.eq.s32.totalorder %v3546_v17, %v3638_v20  ;;  %v3651_v50 = vrot.slane %v1689_v38, %v3518_v22  ;;  %v2450_v37 = vcvt.f32.s32 %v2449_v30  ;;  %v3656_v23 = vrot.slane %v3551_v19, %v3518_v22 }
 0x867   : > { %1992 = vmatpush1.bf16.msra.mxu0 %v1954_v35  ;;  %v2289_v45 = vsel %vm1842_vm8, 1.0, %v2725_v0  ;;  %vm1678_vm9 = vcmp.gt.s32.totalorder %v1675_v25, 0  ;;  %v1670_v11 = vsel %vm1669_vm3, %v1664_v27, 17  ;;  %v1861_v46 = vsub.f32 1.0, %v1627_v39 }
 0x868   : > { %v1884_v60 = vmul.f32 %v2289_v45, %v3648_v44  ;;  %vm1905_vm10 = vcmp.eq.s32.totalorder %v3546_v17, %v3651_v50  ;;  %v1679_v41 = vsel %vm1678_vm9, %v1675_v25, 0  ;;  %v3667_v19 = vrot.slane %v1670_v11, %v3518_v22 }
 0x869   : > { %v2298_v14 = vsel %vm1905_vm10, 1.0, %v2725_v0  ;;  %vm1684_vm11 = vcmp.lt.s32.totalorder %v1679_v41, 17  ;;  %vm1665_vm14 = vcmp.gt.s32.totalorder %v2450_v37, 0  ;;  %v1676_v63 = vadd.s32 1, %v2450_v37 }
 0x86a   : > { %2300 = vmatmul.mubr.msk.bf16.vlgmr.msra.gmra.mxu0 %vm1960_vm13, %v3510_v21  ;;  %v1944_v26 = vmul.f32 %v2298_v14, %v3656_v23  ;;  %v1685_v47 = vsel %vm1684_vm11, %v1679_v41, 17  ;;  %v1666_v1 = vsel %vm1665_vm14, %v2450_v37, 0  ;;  %v1628_v21 = vsub.f32 %v3566_v43, %v1622_v8 }
 0x86b   : > { %2019 = vmatprep.mubr.bf16.mxu0 %v2732_v6  ;;  %v3672_v3 = vrot.slane %v1685_v47, %v3518_v22  ;;  %vm1671_vm15 = vcmp.lt.s32.totalorder %v1666_v1, 17  ;;  %vm1680_vm0 = vcmp.gt.s32.totalorder %v1676_v63, 0  ;;  %v3678_v6 = vrot.slane %v1861_v46, %v3518_v22 }
 0x86c   : > { %v3669_v55 = vadd.f32 %v1944_v26, %v1884_v60  ;;  %v1672_v49 = vsel %vm1671_vm15, %v1666_v1, 17  ;;  %v1681_v59 = vsel %vm1680_vm0, %v1676_v63, 0  ;;  %vm1837_vm2 = vcmp.eq.s32.totalorder %v3549_v18, %v3667_v19 }
 0x86d   : > { %vm1686_vm1 = vcmp.lt.s32.totalorder %v1681_v59, 17  ;;  %v3681_v56 = vrot.slane %v1672_v49, %v3518_v22  ;;  %vm1900_vm4 = vcmp.eq.s32.totalorder %v3549_v18, %v3672_v3  ;;  %v3688_v51 = vrot.slane %v1627_v39, %v3518_v22 }
 0x86e   : > { %v1687_v43 = vsel %vm1686_vm1, %v1681_v59, 17  ;;  %v1862_v42 = vsub.f32 1.0, %v1628_v21  ;;  %v2284_v8 = vsel %vm1837_vm2, 1.0, %v2725_v0  ;;  %v2293_v54 = vsel %vm1900_vm4, 1.0, %v2725_v0 }
 0x86f   : > { %v1892_v58 = vrot.slane %v1687_v43, %v3518_v22  ;;  %v1879_v40 = vmul.f32 %v2284_v8, %v3678_v6  ;;  %v1939_v61 = vmul.f32 %v2293_v54, %v3688_v51  ;;  %vm1839_vm5 = vcmp.eq.s32.totalorder %v3549_v18, %v3638_v20 }
 0x870   : > { %vm1902_vm6 = vcmp.eq.s32.totalorder %v3549_v18, %v3651_v50  ;;  %v2286_v53 = vsel %vm1839_vm5, 1.0, %v2725_v0  ;;  %v1931_v12 = vrot.slane %v1628_v21, %v3518_v22  ;;  %vm1840_vm3 = vcmp.eq.s32.totalorder %v3546_v17, %v3667_v19 }
 0x871   : > { %v2295_v52 = vsel %vm1902_vm6, 1.0, %v2725_v0  ;;  %v1948_v4 = vadd.f32 %v1939_v61, %v1879_v40  ;;  %v1881_v9 = vmul.f32 %v2286_v53, %v3648_v44  ;;  %vm1901_vm7 = vcmp.eq.s32.totalorder %v3549_v18, %v1892_v58 }
 0x872   : > { %2301 = vmatmul.mubr.msk.bf16.gmra.mxu0 %vm1960_vm13, %v3555_v13  ;;  %vm1838_vm13 = vcmp.eq.s32.totalorder %v3549_v18, %v3681_v56  ;;  %v1871_v13 = vrot.slane %v1862_v42, %v3518_v22  ;;  %v1941_v7 = vmul.f32 %v2295_v52, %v3656_v23  ;;  %v2294_v48 = vsel %vm1901_vm7, 1.0, %v2725_v0 }
 0x873   : > { %v2285_v57 = vsel %vm1838_vm13, 1.0, %v2725_v0  ;;  %v2287_v10 = vsel %vm1840_vm3, 1.0, %v2725_v0  ;;  %v1940_v5 = vmul.f32 %v2294_v48, %v1931_v12  ;;  %vm1903_vm8 = vcmp.eq.s32.totalorder %v3546_v17, %v3672_v3 }
 0x874   : > { %v1950_v15 = vadd.f32 %v1941_v7, %v1881_v9  ;;  %v1880_v16 = vmul.f32 %v2285_v57, %v1871_v13  ;;  %v1882_v24 = vmul.f32 %v2287_v10, %v3678_v6  ;;  %v2296_v22 = vsel %vm1903_vm8, 1.0, %v2725_v0 }
 0x875   : > { %vm1841_vm9 = vcmp.eq.s32.totalorder %v3546_v17, %v3681_v56  ;;  %vm1904_vm10 = vcmp.eq.s32.totalorder %v3546_v17, %v1892_v58  ;;  %v1942_v29 = vmul.f32 %v2296_v22, %v3688_v51  ;;  %vm1899_vm11 = vcmp.eq.s32.totalorder %v2915_v28, %v3651_v50 }
 0x876   : > { %v1949_v18 = vadd.f32 %v1940_v5, %v1880_v16  ;;  %v2288_v30 = vsel %vm1841_vm9, 1.0, %v2725_v0  ;;  %v2297_v31 = vsel %vm1904_vm10, 1.0, %v2725_v0  ;;  %vm1836_vm14 = vcmp.eq.s32.totalorder %v2915_v28, %v3638_v20 }
 0x877   : > { %v1883_v32 = vmul.f32 %v2288_v30, %v1871_v13  ;;  %v1943_v27 = vmul.f32 %v2297_v31, %v1931_v12  ;;  %v1951_v35 = vadd.f32 %v1942_v29, %v1882_v24  ;;  %v2292_v25 = vsel %vm1899_vm11, 1.0, %v2725_v0 }
 0x878   : > { %v2283_v39 = vsel %vm1836_vm14, 1.0, %v2725_v0  ;;  %v1938_v37 = vmul.f32 %v2292_v25, %v3656_v23  ;;  %vm2086_vm15 = vcmask 1041408   ;;  %vm1897_vm0 = vcmp.eq.s32.totalorder %v2915_v28, %v3672_v3 }
 0x879   : > { %v1952_v38 = vadd.f32 %v1943_v27, %v1883_v32  ;;  %v1878_v60 = vmul.f32 %v2283_v39, %v3648_v44  ;;  %vm1834_vm1 = vcmp.eq.s32.totalorder %v2915_v28, %v3667_v19  ;;  %vm1898_vm2 = vcmp.eq.s32.totalorder %v2915_v28, %v1892_v58 }
 0x87a   : > { %v2290_v44 = vsel %vm1897_vm0, 1.0, %v2725_v0  ;;  %vm1835_vm4 = vcmp.eq.s32.totalorder %v2915_v28, %v3681_v56  ;;  %v2291_v3 = vsel %vm1898_vm2, 1.0, %v2725_v0 }
 0x87b   : > { %v1947_v41 = vadd.f32 %v1938_v37, %v1878_v60  ;;  %v1936_v1 = vmul.f32 %v2290_v44, %v3688_v51  ;;  %v2282_v19 = vsel %vm1835_vm4, 1.0, %v2725_v0  ;;  %v1937_v49 = vmul.f32 %v2291_v3, %v1931_v12 }
 0x87c   : > { %v1877_v42 = vmul.f32 %v2282_v19, %v1871_v13 }
 0x87e   : > { %v1946_v28 = vadd.f32 %v1937_v49, %v1877_v42 }
 0x91c   : > { %v2437_v17 = vpop.f32.mrf.mxu1 }
 0x91d   : > { %v2084_v14 = vmul.f32 %v2437_v17, %v3669_v55  ;;  %v2281_v55 = vsel %vm1834_vm1, 1.0, %v2725_v0 }
 0x91e   : > { %v2062_v45 = vpop.f32.mrf.mxu1  ;;  %v1876_v21 = vmul.f32 %v2281_v55, %v3678_v6 }
 0x91f   : > { %v2078_v20 = vmul.f32 %v2062_v45, %v1947_v41  ;;  %v2105_v47 = vsel %vm2086_vm15, %v2084_v14, 0.0 }
 0x920   : > { %v2438_v11 = vpop.f32.mrf.mxu1  ;;  %v1945_v43 = vadd.f32 %v1936_v1, %v1876_v21 }
 0x922   : > { %v2065_v26 = vpop.f32.mrf.mxu1 }
 0x923   : > { %v2081_v50 = vmul.f32 %v2065_v26, %v1950_v15 }
 0x925   : > { %v2104_v23 = vadd.f32 %v2081_v50, %v2078_v20 }
 0x927   : > { %v2106_v46 = vadd.f32 %v2105_v47, %v2104_v23 }
 0x929   : > { %v2107_v58 = vrot.slane %v2106_v46, 4 }
 0x92a   : > { %v2011_v63 = vpop.f32.mrf.mxu0 }
 0x92b   : > { %v2076_v40 = vmul.f32 %v2011_v63, %v1945_v43  ;;  %v2108_v9 = vadd.f32 %v2107_v58, %v2106_v46 }
 0x92c   : > { %v2013_v59 = vpop.f32.mrf.mxu0 }
 0x92d   : > { %v2077_v61 = vmul.f32 %v2013_v59, %v1946_v28  ;;  %v2109_v15 = vrot.slane %v2108_v9, 2 }
 0x92e   : > { %v2015_v8 = vpop.f32.mrf.mxu0 }
 0x92f   : > { %v2079_v56 = vmul.f32 %v2015_v8, %v1948_v4  ;;  %v2110_v24 = vadd.f32 %v2109_v15, %v2108_v9 }
 0x930   : > { %v2017_v54 = vpop.f32.mrf.mxu0 }
 0x931   : > { %v2085_v53 = vadd.f32 %v2079_v56, %v2076_v40  ;;  %v2080_v52 = vmul.f32 %v2017_v54, %v1949_v18  ;;  %v2111_v31 = vrot.slane %v2110_v24, 1 }
 0x932   : > { %v2021_v51 = vpop.f32.mrf.mxu0 }
 0x933   : > { %v2095_v7 = vadd.f32 %v2080_v52, %v2077_v61  ;;  %v2082_v57 = vmul.f32 %v2021_v51, %v1951_v35 }
 0x934   : > { %v2023_v0 = vpop.f32.mrf.mxu0 }
 0x935   : > { %v2087_v6 = vsel %vm2086_vm15, %v2082_v57, 0.0  ;;  %v2083_v12 = vmul.f32 %v2023_v0, %v1952_v38  ;;  %v2112_v38 = vadd.f32 %v2111_v31, %v2110_v24 }
 0x936   : > { %v2088_v16 = vadd.f32 %v2087_v6, %v2085_v53  ;;  %v2025_v13 = vpop.f32.mrf.mxu0 }
 0x937   : > { %v2096_v48 = vsel %vm2086_vm15, %v2083_v12, 0.0  ;;  %v2115_v45 = vmul.f32 %v2112_v38, %v2927_v34 }
 0x938   : > { %v2089_v10 = vrot.slane %v2088_v16, 4  ;;  %v2097_v5 = vadd.f32 %v2096_v48, %v2095_v7  ;;  %v2026_v4 = vpop.f32.mrf.mxu0 }
 0x939   : > { %v2133_v14 = vrot.slane %v2115_v45, %v3179_v2 }
 0x93a   : > { %v2090_v22 = vadd.f32 %v2089_v10, %v2088_v16  ;;  %v2098_v29 = vrot.slane %v2097_v5, 4 }
 0x93c   : > { %v2091_v18 = vrot.slane %v2090_v22, 2  ;;  %v2099_v30 = vadd.f32 %v2098_v29, %v2097_v5 }
 0x93e   : > { %v2092_v32 = vadd.f32 %v2091_v18, %v2090_v22  ;;  %v2100_v27 = vrot.slane %v2099_v30, 2 }
 0x940   : > { %v2093_v35 = vrot.slane %v2092_v32, 1  ;;  %v2101_v25 = vadd.f32 %v2100_v27, %v2099_v30 }
 0x942   : > { %v2094_v17 = vadd.f32 %v2093_v35, %v2092_v32  ;;  %v2102_v39 = vrot.slane %v2101_v25, 1 }
 0x944   : > { %v2103_v37 = vadd.f32 %v2102_v39, %v2101_v25  ;;  %v2113_v60 = vmul.f32 %v2094_v17, %v2925_v33 }
 0x946   : > { %v2114_v11 = vmul.f32 %v2103_v37, %v2929_v36 }
 0x948   : > { %v2119_v41 = vcombine.low %v2113_v60, %v2114_v11 }
 0x94a   : > { %v2126_v26 = vrot.slane %v2119_v41, %v3179_v2 }
 0x94c   : > { %v2134_v20 = vcombine.low %v2126_v26, %v2133_v14 }
 0x94e   : > { %v2141_v50 = vrot.slane %v2134_v20, %v3179_v2 }
 0x950   : > { %2304 = vst.msk [vmem:[%s3161_s19 + $0x3] ss:$8 sm:$0x7] %vm3199_vm12, %v2141_v50 }
 0x951 PF: > { %s16_s21 = sadd.s32 1, %s2723_s21  }
 0x952   : > { %p13_p4 = scmp.ge.s32.totalorder %s16_s21, 4  }
 0x954   :  { %15 = sbr.rel (!%p13_p4) target bundleno = 1 (0x1), region = 91 }

</bundles_post_ra>
